<compile_context>
chip_gen: v6e
topology: v6e:2x2x1
jax: 0.10.0
libtpu: 0.0.40
codegen_flags: <defaults>
</compile_context>

<pallas_src>
import jax
import jax.numpy as jnp
import numpy as np
from jax.experimental import pallas as pl
from jax.experimental.pallas import tpu as pltpu  # noqa: F401  (kept for TPU-specific extensions)

# ----------------------- model config (small, synthetic) -----------------------
B, S, DIM = 2, 16, 64
N_HEADS = 4
Q_LORA = 32            # q_lora_rank > 0  -> wq_a / q_norm / wq_b path
KV_LORA = 32
QK_NOPE = 16
QK_ROPE = 8
QK_HD = QK_NOPE + QK_ROPE          # 24
V_HD = 16
INTER = 128
EPS = 1e-6
SCALE = QK_HD ** (-0.5)            # max_seq_len == original_seq_len -> no mscale
HALF = QK_ROPE // 2                # 4


# =========================== fused Pallas kernel ==============================

def _fused_block_kernel(
    x_ref,
    qc_ref, qsp_ref, qsm_ref, kcos_ref, ksin_ref, mask_ref,
    attn_nw_ref, q_nw_ref, kv_nw_ref, ffn_nw_ref,
    wqa_ref, wqb_ref, wkva_ref, wkvb_ref, wo_ref,
    w1_ref, w2_ref, w3_ref,
    o_ref,
):
    f32 = jnp.float32
    bf16 = jnp.bfloat16

    x = x_ref[...]                                    # (R, DIM) f32, R = B*S

    def rms(v, w_ref):                                # exact f32 RMSNorm
        var = jnp.mean(v * v, axis=-1, keepdims=True)
        return v * jax.lax.rsqrt(var + EPS) * w_ref[...]

    def mm(a, w_ref):                                 # bf16 x bf16 MXU, f32 accumulate
        return jnp.dot(a.astype(bf16), w_ref[...], preferred_element_type=f32)

    # ---------------- attention branch ----------------
    xn = rms(x, attn_nw_ref)                          # (R, DIM)

    ql = rms(mm(xn, wqa_ref), q_nw_ref)               # (R, Q_LORA)
    qf = mm(ql, wqb_ref)                              # (R, 96); SCALE folded in,
                                                      # per-head layout [nope16 | re4 | im4]

    kva = mm(xn, wkva_ref)                            # (R, KV_LORA + QK_ROPE) = (R, 40)
    kvl = rms(kva[:, :KV_LORA], kv_nw_ref)            # (R, KV_LORA)
    kvf = mm(kvl, wkvb_ref)                           # (R, 128); per-head [k_nope16 | v16]

    # --- RoPE on ALL q heads at once (VPU only: lane shifts + masked sin tables) ---
    R = x.shape[0]
    z4 = jnp.zeros((R, HALF), f32)
    q_p4 = jnp.concatenate([z4, qf[:, :-HALF]], axis=-1)   # col j <- qf col j-4
    q_m4 = jnp.concatenate([qf[:, HALF:], z4], axis=-1)    # col j <- qf col j+4
    qb = (qf * qc_ref[...] + q_p4 * qsp_ref[...] + q_m4 * qsm_ref[...]).astype(bf16)

    # --- RoPE on the single shared k_pe head ---
    kre = kva[:, KV_LORA:KV_LORA + HALF]
    kim = kva[:, KV_LORA + HALF:KV_LORA + QK_ROPE]
    kcos = kcos_ref[...]
    ksin = ksin_ref[...]
    kpe = jnp.concatenate(
        [kre * kcos - kim * ksin, kre * ksin + kim * kcos], axis=-1).astype(bf16)

    # --- fused K slab: per head [k_nope | k_pe], built once in bf16 ---
    kd = QK_NOPE + V_HD
    kb = jnp.concatenate(
        [piece
         for h in range(N_HEADS)
         for piece in (kvf[:, h * kd:h * kd + QK_NOPE].astype(bf16), kpe)],
        axis=-1)                                      # (R, N_HEADS*QK_HD) = (R, 96)

    mask = mask_ref[...]                              # (R, R) additive block-diag causal
    wo = wo_ref[...]                                  # (N_HEADS*V_HD, DIM) bf16

    attn_acc = jnp.zeros((R, DIM), f32)
    for h in range(N_HEADS):                          # static unroll, all in VMEM/vregs
        qh = qb[:, h * QK_HD:(h + 1) * QK_HD]         # (R, 24) bf16, scale already applied
        kh = kb[:, h * QK_HD:(h + 1) * QK_HD]         # (R, 24) bf16
        sc = jax.lax.dot_general(qh, kh, (((1,), (1,)), ((), ())),
                                 preferred_element_type=f32) + mask   # (R, R) f32
        m = jnp.max(sc, axis=-1, keepdims=True)
        p = jnp.exp(sc - m)
        pw = p / jnp.sum(p, axis=-1, keepdims=True)   # exact f32 softmax
        vh = kvf[:, h * kd + QK_NOPE:(h + 1) * kd].astype(bf16)        # (R, V_HD)
        oh = jnp.dot(pw.astype(bf16), vh, preferred_element_type=f32)  # (R, V_HD)
        # accumulate directly into the residual contribution (no head concat)
        attn_acc = attn_acc + jnp.dot(oh.astype(bf16),
                                      wo[h * V_HD:(h + 1) * V_HD, :],
                                      preferred_element_type=f32)

    x1 = x + attn_acc                                 # residual 1 (f32)

    # ---------------- feed-forward branch (dense layer) ----------------
    hn = rms(x1, ffn_nw_ref)
    h1 = mm(hn, w1_ref)                               # (R, INTER) lane-dense (128)
    h3 = mm(hn, w3_ref)
    hh = h1 * jax.nn.sigmoid(h1) * h3                 # SwiGLU (f32)
    o_ref[...] = (x1 + mm(hh, w2_ref)).astype(o_ref.dtype)


def transformer_block(x, tables, pp):
    """x: (B, S, DIM). tables: precomputed rope/mask tables. pp: prepared params."""
    b, s, d = x.shape
    x2d = x.reshape(b * s, d)
    out2d = pl.pallas_call(
        _fused_block_kernel,
        out_shape=jax.ShapeDtypeStruct((b * s, d), x.dtype),
        # No grid: single invocation, every operand is a whole-array VMEM block.
        # (grid=(B,) on a single-TC chip was just a serial loop of 16-row matmuls.)
    )(x2d,
      tables["qc"], tables["qsp"], tables["qsm"],
      tables["kcos"], tables["ksin"], tables["mask"],
      pp["attn_nw"], pp["q_nw"], pp["kv_nw"], pp["ffn_nw"],
      pp["wq_a"], pp["wq_b"], pp["wkv_a"], pp["wkv_b"], pp["wo"],
      pp["w1"], pp["w2"], pp["w3"])
    return out2d.reshape(b, s, d)


# ============================== parameter prep ================================

def init_params(key):
    ks = jax.random.split(key, 10)
    std = 0.02  # TODO(synk): trunc_normal_ clipping not reproduced; plain normal*std used

    def w(k, shape):
        return jax.random.normal(k, shape, dtype=jnp.float32) * std

    # PyTorch nn.Linear layout: (out_features, in_features)
    return {
        "attention_norm_w": jnp.ones((DIM,), jnp.float32),
        "ffn_norm_w": jnp.ones((DIM,), jnp.float32),
        "q_norm_w": jnp.ones((Q_LORA,), jnp.float32),
        "kv_norm_w": jnp.ones((KV_LORA,), jnp.float32),
        "wq_a": w(ks[0], (Q_LORA, DIM)),
        "wq_b": w(ks[1], (N_HEADS * QK_HD, Q_LORA)),
        "wkv_a": w(ks[2], (KV_LORA + QK_ROPE, DIM)),
        "wkv_b": w(ks[3], (N_HEADS * (QK_NOPE + V_HD), KV_LORA)),
        "wo": w(ks[4], (DIM, N_HEADS * V_HD)),
        "w1": w(ks[5], (INTER, DIM)),
        "w2": w(ks[6], (DIM, INTER)),
        "w3": w(ks[7], (INTER, DIM)),
    }


def prepare_params(p):
    """One-time (outside jit) layout prep:
       * (out,in) -> (in,out) transpose,
       * wq_b: per-head pe columns de-interleaved to [re|im], softmax SCALE folded in,
       * wkv_a: k_pe columns de-interleaved to [re|im],
       * all matmul weights cast to bf16 (MXU operands); norm weights stay f32."""
    bf16 = jnp.bfloat16

    # wq_b column permutation: per head [nope(16), re(4), im(4)]
    perm = []
    for h in range(N_HEADS):
        base = h * QK_HD
        perm += list(range(base, base + QK_NOPE))
        perm += [base + QK_NOPE + 2 * i for i in range(HALF)]       # re
        perm += [base + QK_NOPE + 2 * i + 1 for i in range(HALF)]   # im
    wq_b_t = (p["wq_b"].T)[:, np.asarray(perm)] * SCALE             # fold softmax scale into q

    # wkv_a column permutation: trailing k_pe block de-interleaved to [re|im]
    kperm = list(range(KV_LORA)) \
        + [KV_LORA + 2 * i for i in range(HALF)] \
        + [KV_LORA + 2 * i + 1 for i in range(HALF)]
    wkv_a_t = (p["wkv_a"].T)[:, np.asarray(kperm)]

    return {
        "attn_nw": p["attention_norm_w"].reshape(1, DIM),
        "ffn_nw": p["ffn_norm_w"].reshape(1, DIM),
        "q_nw": p["q_norm_w"].reshape(1, Q_LORA),
        "kv_nw": p["kv_norm_w"].reshape(1, KV_LORA),
        "wq_a": jnp.asarray(p["wq_a"].T, bf16),
        "wq_b": jnp.asarray(wq_b_t, bf16),
        "wkv_a": jnp.asarray(wkv_a_t, bf16),
        "wkv_b": jnp.asarray(p["wkv_b"].T, bf16),
        "wo": jnp.asarray(p["wo"].T, bf16),
        "w1": jnp.asarray(p["w1"].T, bf16),
        "w2": jnp.asarray(p["w2"].T, bf16),
        "w3": jnp.asarray(p["w3"].T, bf16),
    }


def make_freqs(seq_len, rope_dim, theta=10000.0):
    half = rope_dim // 2
    inv = 1.0 / (theta ** (jnp.arange(half, dtype=jnp.float32) * 2.0 / rope_dim))
    t = jnp.arange(seq_len, dtype=jnp.float32)
    ang = jnp.outer(t, inv)                                    # (S, half)
    return jnp.cos(ang), jnp.sin(ang)


def make_tables(b, s, cos, sin):
    """Precompute (host-side, once) the RoPE multiplier slabs and the additive
    block-diagonal causal mask for the folded (B*S) row layout.
      qc  : multiplier for q itself        (1 on nope cols, cos on pe cols)
      qsp : multiplier for q shifted by +4 (sin on im cols, 0 elsewhere)
      qsm : multiplier for q shifted by -4 (-sin on re cols, 0 elsewhere)"""
    cos = np.asarray(cos, np.float32)          # (s, HALF)
    sin = np.asarray(sin, np.float32)
    cosr = np.tile(cos, (b, 1))                # (b*s, HALF), row r -> position r % s
    sinr = np.tile(sin, (b, 1))

    q_cols = N_HEADS * QK_HD
    qc = np.ones((b * s, q_cols), np.float32)
    qsp = np.zeros((b * s, q_cols), np.float32)
    qsm = np.zeros((b * s, q_cols), np.float32)
    for h in range(N_HEADS):
        re0 = h * QK_HD + QK_NOPE
        im0 = re0 + HALF
        qc[:, re0:re0 + HALF] = cosr
        qc[:, im0:im0 + HALF] = cosr
        qsm[:, re0:re0 + HALF] = -sinr         # re' = re*cos - im*sin  (im sits at col+4)
        qsp[:, im0:im0 + HALF] = sinr          # im' = im*cos + re*sin  (re sits at col-4)

    r = np.arange(b * s)
    same_batch = (r[:, None] // s) == (r[None, :] // s)
    causal = (r[None, :] % s) <= (r[:, None] % s)
    mask = np.where(same_batch & causal, 0.0, -1e30).astype(np.float32)

    jf = jnp.asarray
    return {"qc": jf(qc), "qsp": jf(qsp), "qsm": jf(qsm),
            "kcos": jf(cosr), "ksin": jf(sinr), "mask": jf(mask)}


# ======================= pure-JAX reference (for checking) =====================

def _apply_rotary_emb_ref(x, cos, sin):
    """x: (B, S, H, rope) interleaved pairs; cos/sin: (S, rope//2)."""
    xf = x.astype(jnp.float32)
    xr = xf.reshape(*xf.shape[:-1], -1, 2)
    re, im = xr[..., 0], xr[..., 1]
    c = cos[None, :, None, :]
    sn = sin[None, :, None, :]
    y = jnp.stack([re * c - im * sn, re * sn + im * c], axis=-1)
    return y.reshape(x.shape).astype(x.dtype)


def reference_block(x, cos, sin, p):
    b, s, dim = x.shape
    n = b * s

    def rms(v, w):
        var = jnp.mean(v * v, axis=-1, keepdims=True)
        return v * jax.lax.rsqrt(var + EPS) * w

    xf = x.reshape(n, dim)
    xn = rms(xf, p["attention_norm_w"])

    q = (rms(xn @ p["wq_a"].T, p["q_norm_w"]) @ p["wq_b"].T).reshape(b, s, N_HEADS, QK_HD)
    q_nope, q_pe = q[..., :QK_NOPE], q[..., QK_NOPE:]
    q_pe = _apply_rotary_emb_ref(q_pe, cos, sin)
    q = jnp.concatenate([q_nope, q_pe], axis=-1)

    kv = xn @ p["wkv_a"].T
    kv_lat = kv[:, :KV_LORA]
    k_pe = _apply_rotary_emb_ref(kv[:, KV_LORA:].reshape(b, s, 1, QK_ROPE), cos, sin)
    kvb = (rms(kv_lat, p["kv_norm_w"]) @ p["wkv_b"].T).reshape(b, s, N_HEADS, QK_NOPE + V_HD)
    k_nope, v = kvb[..., :QK_NOPE], kvb[..., QK_NOPE:]
    k = jnp.concatenate(
        [k_nope, jnp.broadcast_to(k_pe, (b, s, N_HEADS, QK_ROPE))], axis=-1)

    scores = jnp.einsum("bihd,bjhd->bhij", q, k) * SCALE
    mask = jnp.tril(jnp.ones((s, s), bool))
    scores = jnp.where(mask[None, None], scores, -jnp.inf)
    pa = jax.nn.softmax(scores, axis=-1)
    attn = jnp.einsum("bhij,bjhd->bihd", pa, v).reshape(n, N_HEADS * V_HD)
    x1 = xf + attn @ p["wo"].T

    h = rms(x1, p["ffn_norm_w"])
    ffn = (jax.nn.silu(h @ p["w1"].T) * (h @ p["w3"].T)) @ p["w2"].T
    return (x1 + ffn).reshape(b, s, dim)


# ==================================== main =====================================

if __name__ == "__main__":
    key = jax.random.PRNGKey(0)
    k_x, k_p = jax.random.split(key)
    x = jax.random.normal(k_x, (B, S, DIM), dtype=jnp.float32)

    params = init_params(k_p)
    prepared = prepare_params(params)      # one-time weight transpose / permute / bf16 cast
    cos, sin = make_freqs(S, QK_ROPE)
    tables = make_tables(B, S, cos, sin)   # one-time rope-multiplier & mask tables

    fwd = jax.jit(transformer_block)
    out = fwd(x, tables, prepared)
    out = jax.block_until_ready(out)

    assert out.shape == (B, S, DIM), out.shape
    assert bool(jnp.all(jnp.isfinite(out)))

    ref = reference_block(x, cos, sin, params)
    max_err = float(jnp.max(jnp.abs(out - ref)))
    assert max_err < 1e-2, f"mismatch vs reference: {max_err}"

    print("KERNEL_OK")
</pallas_src>

<mosaic_0001>
module attributes {stable_mosaic.version = 11 : i64} {
  func.func @_fused_block_kernel(%arg0: memref<32x64xf32, #tpu.memory_space<vmem>>, %arg1: memref<32x96xf32, #tpu.memory_space<vmem>>, %arg2: memref<32x96xf32, #tpu.memory_space<vmem>>, %arg3: memref<32x96xf32, #tpu.memory_space<vmem>>, %arg4: memref<32x4xf32, #tpu.memory_space<vmem>>, %arg5: memref<32x4xf32, #tpu.memory_space<vmem>>, %arg6: memref<32x32xf32, #tpu.memory_space<vmem>>, %arg7: memref<1x64xf32, #tpu.memory_space<vmem>>, %arg8: memref<1x32xf32, #tpu.memory_space<vmem>>, %arg9: memref<1x32xf32, #tpu.memory_space<vmem>>, %arg10: memref<1x64xf32, #tpu.memory_space<vmem>>, %arg11: memref<64x32xbf16, #tpu.memory_space<vmem>>, %arg12: memref<32x96xbf16, #tpu.memory_space<vmem>>, %arg13: memref<64x40xbf16, #tpu.memory_space<vmem>>, %arg14: memref<32x128xbf16, #tpu.memory_space<vmem>>, %arg15: memref<64x64xbf16, #tpu.memory_space<vmem>>, %arg16: memref<64x128xbf16, #tpu.memory_space<vmem>>, %arg17: memref<128x64xbf16, #tpu.memory_space<vmem>>, %arg18: memref<64x128xbf16, #tpu.memory_space<vmem>>, %arg19: memref<32x64xf32, #tpu.memory_space<vmem>>) attributes {dimension_semantics = [], scalar_prefetch = 0 : i64, scratch_operands = 0 : i64, tpu.core_type = #tpu.core_type<tc>} {
    %c0 = arith.constant 0 : index
    %c0_0 = arith.constant 0 : index
    %0 = vector.load %arg0[%c0, %c0_0] : memref<32x64xf32, #tpu.memory_space<vmem>>, vector<32x64xf32>
    %1 = arith.mulf %0, %0 : vector<32x64xf32>
    %cst = arith.constant dense<0.000000e+00> : vector<32xf32>
    %2 = vector.multi_reduction <add>, %1, %cst [1] : vector<32x64xf32> to vector<32xf32>
    %3 = vector.shape_cast %2 : vector<32xf32> to vector<32x1xf32>
    %cst_1 = arith.constant 6.400000e+01 : f32
    %4 = vector.broadcast %cst_1 : f32 to vector<32x1xf32>
    %5 = arith.divf %3, %4 : vector<32x1xf32>
    %cst_2 = arith.constant 9.99999997E-7 : f32
    %6 = vector.broadcast %cst_2 : f32 to vector<32x1xf32>
    %7 = arith.addf %5, %6 : vector<32x1xf32>
    %8 = math.rsqrt %7 : vector<32x1xf32>
    %9 = vector.broadcast %8 : vector<32x1xf32> to vector<32x64xf32>
    %10 = arith.mulf %0, %9 : vector<32x64xf32>
    %c0_3 = arith.constant 0 : index
    %c0_4 = arith.constant 0 : index
    %11 = vector.load %arg7[%c0_3, %c0_4] : memref<1x64xf32, #tpu.memory_space<vmem>>, vector<1x64xf32>
    %12 = vector.broadcast %11 : vector<1x64xf32> to vector<32x64xf32>
    %13 = arith.mulf %10, %12 : vector<32x64xf32>
    %14 = arith.truncf %13 : vector<32x64xf32> to vector<32x64xbf16>
    %c0_5 = arith.constant 0 : index
    %c0_6 = arith.constant 0 : index
    %15 = vector.load %arg11[%c0_5, %c0_6] : memref<64x32xbf16, #tpu.memory_space<vmem>>, vector<64x32xbf16>
    %cst_7 = arith.constant dense<0.000000e+00> : vector<32x32xf32>
    %16 = tpu.matmul %14, %15, %cst_7 {dimension_numbers = #tpu.dot_dimension_numbers<[1], [0], [0], [1], [0, 0, 1, 1], [], []>} : vector<32x64xbf16>, vector<64x32xbf16>, vector<32x32xf32> -> vector<32x32xf32>
    %17 = arith.mulf %16, %16 : vector<32x32xf32>
    %cst_8 = arith.constant dense<0.000000e+00> : vector<32xf32>
    %18 = vector.multi_reduction <add>, %17, %cst_8 [1] : vector<32x32xf32> to vector<32xf32>
    %19 = vector.shape_cast %18 : vector<32xf32> to vector<32x1xf32>
    %cst_9 = arith.constant 3.200000e+01 : f32
    %20 = vector.broadcast %cst_9 : f32 to vector<32x1xf32>
    %21 = arith.divf %19, %20 : vector<32x1xf32>
    %cst_10 = arith.constant 9.99999997E-7 : f32
    %22 = vector.broadcast %cst_10 : f32 to vector<32x1xf32>
    %23 = arith.addf %21, %22 : vector<32x1xf32>
    %24 = math.rsqrt %23 : vector<32x1xf32>
    %25 = vector.broadcast %24 : vector<32x1xf32> to vector<32x32xf32>
    %26 = arith.mulf %16, %25 : vector<32x32xf32>
    %c0_11 = arith.constant 0 : index
    %c0_12 = arith.constant 0 : index
    %27 = vector.load %arg8[%c0_11, %c0_12] : memref<1x32xf32, #tpu.memory_space<vmem>>, vector<1x32xf32>
    %28 = vector.broadcast %27 : vector<1x32xf32> to vector<32x32xf32>
    %29 = arith.mulf %26, %28 : vector<32x32xf32>
    %30 = arith.truncf %29 : vector<32x32xf32> to vector<32x32xbf16>
    %c0_13 = arith.constant 0 : index
    %c0_14 = arith.constant 0 : index
    %31 = vector.load %arg12[%c0_13, %c0_14] : memref<32x96xbf16, #tpu.memory_space<vmem>>, vector<32x96xbf16>
    %cst_15 = arith.constant dense<0.000000e+00> : vector<32x96xf32>
    %32 = tpu.matmul %30, %31, %cst_15 {dimension_numbers = #tpu.dot_dimension_numbers<[1], [0], [0], [1], [0, 0, 1, 1], [], []>} : vector<32x32xbf16>, vector<32x96xbf16>, vector<32x96xf32> -> vector<32x96xf32>
    %33 = arith.truncf %13 : vector<32x64xf32> to vector<32x64xbf16>
    %c0_16 = arith.constant 0 : index
    %c0_17 = arith.constant 0 : index
    %34 = vector.load %arg13[%c0_16, %c0_17] : memref<64x40xbf16, #tpu.memory_space<vmem>>, vector<64x40xbf16>
    %cst_18 = arith.constant dense<0.000000e+00> : vector<32x40xf32>
    %35 = tpu.matmul %33, %34, %cst_18 {dimension_numbers = #tpu.dot_dimension_numbers<[1], [0], [0], [1], [0, 0, 1, 1], [], []>} : vector<32x64xbf16>, vector<64x40xbf16>, vector<32x40xf32> -> vector<32x40xf32>
    %36 = vector.extract_strided_slice %35 {offsets = [0, 0], sizes = [32, 32], strides = [1, 1]} : vector<32x40xf32> to vector<32x32xf32>
    %37 = arith.mulf %36, %36 : vector<32x32xf32>
    %cst_19 = arith.constant dense<0.000000e+00> : vector<32xf32>
    %38 = vector.multi_reduction <add>, %37, %cst_19 [1] : vector<32x32xf32> to vector<32xf32>
    %39 = vector.shape_cast %38 : vector<32xf32> to vector<32x1xf32>
    %cst_20 = arith.constant 3.200000e+01 : f32
    %40 = vector.broadcast %cst_20 : f32 to vector<32x1xf32>
    %41 = arith.divf %39, %40 : vector<32x1xf32>
    %cst_21 = arith.constant 9.99999997E-7 : f32
    %42 = vector.broadcast %cst_21 : f32 to vector<32x1xf32>
    %43 = arith.addf %41, %42 : vector<32x1xf32>
    %44 = math.rsqrt %43 : vector<32x1xf32>
    %45 = vector.broadcast %44 : vector<32x1xf32> to vector<32x32xf32>
    %46 = arith.mulf %36, %45 : vector<32x32xf32>
    %c0_22 = arith.constant 0 : index
    %c0_23 = arith.constant 0 : index
    %47 = vector.load %arg9[%c0_22, %c0_23] : memref<1x32xf32, #tpu.memory_space<vmem>>, vector<1x32xf32>
    %48 = vector.broadcast %47 : vector<1x32xf32> to vector<32x32xf32>
    %49 = arith.mulf %46, %48 : vector<32x32xf32>
    %50 = arith.truncf %49 : vector<32x32xf32> to vector<32x32xbf16>
    %c0_24 = arith.constant 0 : index
    %c0_25 = arith.constant 0 : index
    %51 = vector.load %arg14[%c0_24, %c0_25] : memref<32x128xbf16, #tpu.memory_space<vmem>>, vector<32x128xbf16>
    %cst_26 = arith.constant dense<0.000000e+00> : vector<32x128xf32>
    %52 = tpu.matmul %50, %51, %cst_26 {dimension_numbers = #tpu.dot_dimension_numbers<[1], [0], [0], [1], [0, 0, 1, 1], [], []>} : vector<32x32xbf16>, vector<32x128xbf16>, vector<32x128xf32> -> vector<32x128xf32>
    %cst_27 = arith.constant 0.000000e+00 : f32
    %53 = vector.broadcast %cst_27 : f32 to vector<32x4xf32>
    %54 = vector.extract_strided_slice %32 {offsets = [0, 0], sizes = [32, 92], strides = [1, 1]} : vector<32x96xf32> to vector<32x92xf32>
    %55 = tpu.concatenate %53, %54 in 1 : vector<32x4xf32>, vector<32x92xf32> -> vector<32x96xf32>
    %56 = vector.extract_strided_slice %32 {offsets = [0, 4], sizes = [32, 92], strides = [1, 1]} : vector<32x96xf32> to vector<32x92xf32>
    %57 = tpu.concatenate %56, %53 in 1 : vector<32x92xf32>, vector<32x4xf32> -> vector<32x96xf32>
    %c0_28 = arith.constant 0 : index
    %c0_29 = arith.constant 0 : index
    %58 = vector.load %arg1[%c0_28, %c0_29] : memref<32x96xf32, #tpu.memory_space<vmem>>, vector<32x96xf32>
    %59 = arith.mulf %32, %58 : vector<32x96xf32>
    %c0_30 = arith.constant 0 : index
    %c0_31 = arith.constant 0 : index
    %60 = vector.load %arg2[%c0_30, %c0_31] : memref<32x96xf32, #tpu.memory_space<vmem>>, vector<32x96xf32>
    %61 = arith.mulf %55, %60 : vector<32x96xf32>
    %62 = arith.addf %59, %61 : vector<32x96xf32>
    %c0_32 = arith.constant 0 : index
    %c0_33 = arith.constant 0 : index
    %63 = vector.load %arg3[%c0_32, %c0_33] : memref<32x96xf32, #tpu.memory_space<vmem>>, vector<32x96xf32>
    %64 = arith.mulf %57, %63 : vector<32x96xf32>
    %65 = arith.addf %62, %64 : vector<32x96xf32>
    %66 = arith.truncf %65 : vector<32x96xf32> to vector<32x96xbf16>
    %67 = vector.extract_strided_slice %35 {offsets = [0, 32], sizes = [32, 4], strides = [1, 1]} : vector<32x40xf32> to vector<32x4xf32>
    %68 = vector.extract_strided_slice %35 {offsets = [0, 36], sizes = [32, 4], strides = [1, 1]} : vector<32x40xf32> to vector<32x4xf32>
    %c0_34 = arith.constant 0 : index
    %c0_35 = arith.constant 0 : index
    %69 = vector.load %arg4[%c0_34, %c0_35] : memref<32x4xf32, #tpu.memory_space<vmem>>, vector<32x4xf32>
    %c0_36 = arith.constant 0 : index
    %c0_37 = arith.constant 0 : index
    %70 = vector.load %arg5[%c0_36, %c0_37] : memref<32x4xf32, #tpu.memory_space<vmem>>, vector<32x4xf32>
    %71 = arith.mulf %67, %69 : vector<32x4xf32>
    %72 = arith.mulf %68, %70 : vector<32x4xf32>
    %73 = arith.subf %71, %72 : vector<32x4xf32>
    %74 = arith.mulf %67, %70 : vector<32x4xf32>
    %75 = arith.mulf %68, %69 : vector<32x4xf32>
    %76 = arith.addf %74, %75 : vector<32x4xf32>
    %77 = tpu.concatenate %73, %76 in 1 : vector<32x4xf32>, vector<32x4xf32> -> vector<32x8xf32>
    %78 = arith.truncf %77 : vector<32x8xf32> to vector<32x8xbf16>
    %79 = vector.extract_strided_slice %52 {offsets = [0, 0], sizes = [32, 16], strides = [1, 1]} : vector<32x128xf32> to vector<32x16xf32>
    %80 = arith.truncf %79 : vector<32x16xf32> to vector<32x16xbf16>
    %81 = vector.extract_strided_slice %52 {offsets = [0, 32], sizes = [32, 16], strides = [1, 1]} : vector<32x128xf32> to vector<32x16xf32>
    %82 = arith.truncf %81 : vector<32x16xf32> to vector<32x16xbf16>
    %83 = vector.extract_strided_slice %52 {offsets = [0, 64], sizes = [32, 16], strides = [1, 1]} : vector<32x128xf32> to vector<32x16xf32>
    %84 = arith.truncf %83 : vector<32x16xf32> to vector<32x16xbf16>
    %85 = vector.extract_strided_slice %52 {offsets = [0, 96], sizes = [32, 16], strides = [1, 1]} : vector<32x128xf32> to vector<32x16xf32>
    %86 = arith.truncf %85 : vector<32x16xf32> to vector<32x16xbf16>
    %87 = tpu.concatenate %80, %78, %82, %78, %84, %78, %86, %78 in 1 : vector<32x16xbf16>, vector<32x8xbf16>, vector<32x16xbf16>, vector<32x8xbf16>, vector<32x16xbf16>, vector<32x8xbf16>, vector<32x16xbf16>, vector<32x8xbf16> -> vector<32x96xbf16>
    %c0_38 = arith.constant 0 : index
    %c0_39 = arith.constant 0 : index
    %88 = vector.load %arg6[%c0_38, %c0_39] : memref<32x32xf32, #tpu.memory_space<vmem>>, vector<32x32xf32>
    %c0_40 = arith.constant 0 : index
    %c0_41 = arith.constant 0 : index
    %89 = vector.load %arg15[%c0_40, %c0_41] : memref<64x64xbf16, #tpu.memory_space<vmem>>, vector<64x64xbf16>
    %cst_42 = arith.constant 0.000000e+00 : f32
    %90 = vector.broadcast %cst_42 : f32 to vector<32x64xf32>
    %91 = vector.extract_strided_slice %66 {offsets = [0, 0], sizes = [32, 24], strides = [1, 1]} : vector<32x96xbf16> to vector<32x24xbf16>
    %92 = vector.extract_strided_slice %87 {offsets = [0, 0], sizes = [32, 24], strides = [1, 1]} : vector<32x96xbf16> to vector<32x24xbf16>
    %cst_43 = arith.constant dense<0.000000e+00> : vector<32x32xf32>
    %93 = tpu.matmul %91, %92, %cst_43 {dimension_numbers = #tpu.dot_dimension_numbers<[1], [1], [0], [0], [0, 0, 1, 0], [], []>} : vector<32x24xbf16>, vector<32x24xbf16>, vector<32x32xf32> -> vector<32x32xf32>
    %94 = arith.addf %93, %88 : vector<32x32xf32>
    %cst_44 = arith.constant dense<0xFF800000> : vector<32xf32>
    %95 = vector.multi_reduction <maximumf>, %94, %cst_44 [1] : vector<32x32xf32> to vector<32xf32>
    %96 = vector.shape_cast %95 : vector<32xf32> to vector<32x1xf32>
    %97 = vector.broadcast %96 : vector<32x1xf32> to vector<32x32xf32>
    %98 = arith.subf %94, %97 : vector<32x32xf32>
    %99 = math.exp %98 : vector<32x32xf32>
    %cst_45 = arith.constant dense<0.000000e+00> : vector<32xf32>
    %100 = vector.multi_reduction <add>, %99, %cst_45 [1] : vector<32x32xf32> to vector<32xf32>
    %101 = vector.shape_cast %100 : vector<32xf32> to vector<32x1xf32>
    %102 = vector.broadcast %101 : vector<32x1xf32> to vector<32x32xf32>
    %103 = arith.divf %99, %102 : vector<32x32xf32>
    %104 = vector.extract_strided_slice %52 {offsets = [0, 16], sizes = [32, 16], strides = [1, 1]} : vector<32x128xf32> to vector<32x16xf32>
    %105 = arith.truncf %104 : vector<32x16xf32> to vector<32x16xbf16>
    %106 = arith.truncf %103 : vector<32x32xf32> to vector<32x32xbf16>
    %cst_46 = arith.constant dense<0.000000e+00> : vector<32x16xf32>
    %107 = tpu.matmul %106, %105, %cst_46 {dimension_numbers = #tpu.dot_dimension_numbers<[1], [0], [0], [1], [0, 0, 1, 1], [], []>} : vector<32x32xbf16>, vector<32x16xbf16>, vector<32x16xf32> -> vector<32x16xf32>
    %108 = arith.truncf %107 : vector<32x16xf32> to vector<32x16xbf16>
    %109 = vector.extract_strided_slice %89 {offsets = [0, 0], sizes = [16, 64], strides = [1, 1]} : vector<64x64xbf16> to vector<16x64xbf16>
    %cst_47 = arith.constant dense<0.000000e+00> : vector<32x64xf32>
    %110 = tpu.matmul %108, %109, %cst_47 {dimension_numbers = #tpu.dot_dimension_numbers<[1], [0], [0], [1], [0, 0, 1, 1], [], []>} : vector<32x16xbf16>, vector<16x64xbf16>, vector<32x64xf32> -> vector<32x64xf32>
    %111 = arith.addf %90, %110 : vector<32x64xf32>
    %112 = vector.extract_strided_slice %66 {offsets = [0, 24], sizes = [32, 24], strides = [1, 1]} : vector<32x96xbf16> to vector<32x24xbf16>
    %113 = vector.extract_strided_slice %87 {offsets = [0, 24], sizes = [32, 24], strides = [1, 1]} : vector<32x96xbf16> to vector<32x24xbf16>
    %cst_48 = arith.constant dense<0.000000e+00> : vector<32x32xf32>
    %114 = tpu.matmul %112, %113, %cst_48 {dimension_numbers = #tpu.dot_dimension_numbers<[1], [1], [0], [0], [0, 0, 1, 0], [], []>} : vector<32x24xbf16>, vector<32x24xbf16>, vector<32x32xf32> -> vector<32x32xf32>
    %115 = arith.addf %114, %88 : vector<32x32xf32>
    %cst_49 = arith.constant dense<0xFF800000> : vector<32xf32>
    %116 = vector.multi_reduction <maximumf>, %115, %cst_49 [1] : vector<32x32xf32> to vector<32xf32>
    %117 = vector.shape_cast %116 : vector<32xf32> to vector<32x1xf32>
    %118 = vector.broadcast %117 : vector<32x1xf32> to vector<32x32xf32>
    %119 = arith.subf %115, %118 : vector<32x32xf32>
    %120 = math.exp %119 : vector<32x32xf32>
    %cst_50 = arith.constant dense<0.000000e+00> : vector<32xf32>
    %121 = vector.multi_reduction <add>, %120, %cst_50 [1] : vector<32x32xf32> to vector<32xf32>
    %122 = vector.shape_cast %121 : vector<32xf32> to vector<32x1xf32>
    %123 = vector.broadcast %122 : vector<32x1xf32> to vector<32x32xf32>
    %124 = arith.divf %120, %123 : vector<32x32xf32>
    %125 = vector.extract_strided_slice %52 {offsets = [0, 48], sizes = [32, 16], strides = [1, 1]} : vector<32x128xf32> to vector<32x16xf32>
    %126 = arith.truncf %125 : vector<32x16xf32> to vector<32x16xbf16>
    %127 = arith.truncf %124 : vector<32x32xf32> to vector<32x32xbf16>
    %cst_51 = arith.constant dense<0.000000e+00> : vector<32x16xf32>
    %128 = tpu.matmul %127, %126, %cst_51 {dimension_numbers = #tpu.dot_dimension_numbers<[1], [0], [0], [1], [0, 0, 1, 1], [], []>} : vector<32x32xbf16>, vector<32x16xbf16>, vector<32x16xf32> -> vector<32x16xf32>
    %129 = arith.truncf %128 : vector<32x16xf32> to vector<32x16xbf16>
    %130 = vector.extract_strided_slice %89 {offsets = [16, 0], sizes = [16, 64], strides = [1, 1]} : vector<64x64xbf16> to vector<16x64xbf16>
    %cst_52 = arith.constant dense<0.000000e+00> : vector<32x64xf32>
    %131 = tpu.matmul %129, %130, %cst_52 {dimension_numbers = #tpu.dot_dimension_numbers<[1], [0], [0], [1], [0, 0, 1, 1], [], []>} : vector<32x16xbf16>, vector<16x64xbf16>, vector<32x64xf32> -> vector<32x64xf32>
    %132 = arith.addf %111, %131 : vector<32x64xf32>
    %133 = vector.extract_strided_slice %66 {offsets = [0, 48], sizes = [32, 24], strides = [1, 1]} : vector<32x96xbf16> to vector<32x24xbf16>
    %134 = vector.extract_strided_slice %87 {offsets = [0, 48], sizes = [32, 24], strides = [1, 1]} : vector<32x96xbf16> to vector<32x24xbf16>
    %cst_53 = arith.constant dense<0.000000e+00> : vector<32x32xf32>
    %135 = tpu.matmul %133, %134, %cst_53 {dimension_numbers = #tpu.dot_dimension_numbers<[1], [1], [0], [0], [0, 0, 1, 0], [], []>} : vector<32x24xbf16>, vector<32x24xbf16>, vector<32x32xf32> -> vector<32x32xf32>
    %136 = arith.addf %135, %88 : vector<32x32xf32>
    %cst_54 = arith.constant dense<0xFF800000> : vector<32xf32>
    %137 = vector.multi_reduction <maximumf>, %136, %cst_54 [1] : vector<32x32xf32> to vector<32xf32>
    %138 = vector.shape_cast %137 : vector<32xf32> to vector<32x1xf32>
    %139 = vector.broadcast %138 : vector<32x1xf32> to vector<32x32xf32>
    %140 = arith.subf %136, %139 : vector<32x32xf32>
    %141 = math.exp %140 : vector<32x32xf32>
    %cst_55 = arith.constant dense<0.000000e+00> : vector<32xf32>
    %142 = vector.multi_reduction <add>, %141, %cst_55 [1] : vector<32x32xf32> to vector<32xf32>
    %143 = vector.shape_cast %142 : vector<32xf32> to vector<32x1xf32>
    %144 = vector.broadcast %143 : vector<32x1xf32> to vector<32x32xf32>
    %145 = arith.divf %141, %144 : vector<32x32xf32>
    %146 = vector.extract_strided_slice %52 {offsets = [0, 80], sizes = [32, 16], strides = [1, 1]} : vector<32x128xf32> to vector<32x16xf32>
    %147 = arith.truncf %146 : vector<32x16xf32> to vector<32x16xbf16>
    %148 = arith.truncf %145 : vector<32x32xf32> to vector<32x32xbf16>
    %cst_56 = arith.constant dense<0.000000e+00> : vector<32x16xf32>
    %149 = tpu.matmul %148, %147, %cst_56 {dimension_numbers = #tpu.dot_dimension_numbers<[1], [0], [0], [1], [0, 0, 1, 1], [], []>} : vector<32x32xbf16>, vector<32x16xbf16>, vector<32x16xf32> -> vector<32x16xf32>
    %150 = arith.truncf %149 : vector<32x16xf32> to vector<32x16xbf16>
    %151 = vector.extract_strided_slice %89 {offsets = [32, 0], sizes = [16, 64], strides = [1, 1]} : vector<64x64xbf16> to vector<16x64xbf16>
    %cst_57 = arith.constant dense<0.000000e+00> : vector<32x64xf32>
    %152 = tpu.matmul %150, %151, %cst_57 {dimension_numbers = #tpu.dot_dimension_numbers<[1], [0], [0], [1], [0, 0, 1, 1], [], []>} : vector<32x16xbf16>, vector<16x64xbf16>, vector<32x64xf32> -> vector<32x64xf32>
    %153 = arith.addf %132, %152 : vector<32x64xf32>
    %154 = vector.extract_strided_slice %66 {offsets = [0, 72], sizes = [32, 24], strides = [1, 1]} : vector<32x96xbf16> to vector<32x24xbf16>
    %155 = vector.extract_strided_slice %87 {offsets = [0, 72], sizes = [32, 24], strides = [1, 1]} : vector<32x96xbf16> to vector<32x24xbf16>
    %cst_58 = arith.constant dense<0.000000e+00> : vector<32x32xf32>
    %156 = tpu.matmul %154, %155, %cst_58 {dimension_numbers = #tpu.dot_dimension_numbers<[1], [1], [0], [0], [0, 0, 1, 0], [], []>} : vector<32x24xbf16>, vector<32x24xbf16>, vector<32x32xf32> -> vector<32x32xf32>
    %157 = arith.addf %156, %88 : vector<32x32xf32>
    %cst_59 = arith.constant dense<0xFF800000> : vector<32xf32>
    %158 = vector.multi_reduction <maximumf>, %157, %cst_59 [1] : vector<32x32xf32> to vector<32xf32>
    %159 = vector.shape_cast %158 : vector<32xf32> to vector<32x1xf32>
    %160 = vector.broadcast %159 : vector<32x1xf32> to vector<32x32xf32>
    %161 = arith.subf %157, %160 : vector<32x32xf32>
    %162 = math.exp %161 : vector<32x32xf32>
    %cst_60 = arith.constant dense<0.000000e+00> : vector<32xf32>
    %163 = vector.multi_reduction <add>, %162, %cst_60 [1] : vector<32x32xf32> to vector<32xf32>
    %164 = vector.shape_cast %163 : vector<32xf32> to vector<32x1xf32>
    %165 = vector.broadcast %164 : vector<32x1xf32> to vector<32x32xf32>
    %166 = arith.divf %162, %165 : vector<32x32xf32>
    %167 = vector.extract_strided_slice %52 {offsets = [0, 112], sizes = [32, 16], strides = [1, 1]} : vector<32x128xf32> to vector<32x16xf32>
    %168 = arith.truncf %167 : vector<32x16xf32> to vector<32x16xbf16>
    %169 = arith.truncf %166 : vector<32x32xf32> to vector<32x32xbf16>
    %cst_61 = arith.constant dense<0.000000e+00> : vector<32x16xf32>
    %170 = tpu.matmul %169, %168, %cst_61 {dimension_numbers = #tpu.dot_dimension_numbers<[1], [0], [0], [1], [0, 0, 1, 1], [], []>} : vector<32x32xbf16>, vector<32x16xbf16>, vector<32x16xf32> -> vector<32x16xf32>
    %171 = arith.truncf %170 : vector<32x16xf32> to vector<32x16xbf16>
    %172 = vector.extract_strided_slice %89 {offsets = [48, 0], sizes = [16, 64], strides = [1, 1]} : vector<64x64xbf16> to vector<16x64xbf16>
    %cst_62 = arith.constant dense<0.000000e+00> : vector<32x64xf32>
    %173 = tpu.matmul %171, %172, %cst_62 {dimension_numbers = #tpu.dot_dimension_numbers<[1], [0], [0], [1], [0, 0, 1, 1], [], []>} : vector<32x16xbf16>, vector<16x64xbf16>, vector<32x64xf32> -> vector<32x64xf32>
    %174 = arith.addf %153, %173 : vector<32x64xf32>
    %175 = arith.addf %0, %174 : vector<32x64xf32>
    %176 = arith.mulf %175, %175 : vector<32x64xf32>
    %cst_63 = arith.constant dense<0.000000e+00> : vector<32xf32>
    %177 = vector.multi_reduction <add>, %176, %cst_63 [1] : vector<32x64xf32> to vector<32xf32>
    %178 = vector.shape_cast %177 : vector<32xf32> to vector<32x1xf32>
    %cst_64 = arith.constant 6.400000e+01 : f32
    %179 = vector.broadcast %cst_64 : f32 to vector<32x1xf32>
    %180 = arith.divf %178, %179 : vector<32x1xf32>
    %cst_65 = arith.constant 9.99999997E-7 : f32
    %181 = vector.broadcast %cst_65 : f32 to vector<32x1xf32>
    %182 = arith.addf %180, %181 : vector<32x1xf32>
    %183 = math.rsqrt %182 : vector<32x1xf32>
    %184 = vector.broadcast %183 : vector<32x1xf32> to vector<32x64xf32>
    %185 = arith.mulf %175, %184 : vector<32x64xf32>
    %c0_66 = arith.constant 0 : index
    %c0_67 = arith.constant 0 : index
    %186 = vector.load %arg10[%c0_66, %c0_67] : memref<1x64xf32, #tpu.memory_space<vmem>>, vector<1x64xf32>
    %187 = vector.broadcast %186 : vector<1x64xf32> to vector<32x64xf32>
    %188 = arith.mulf %185, %187 : vector<32x64xf32>
    %189 = arith.truncf %188 : vector<32x64xf32> to vector<32x64xbf16>
    %c0_68 = arith.constant 0 : index
    %c0_69 = arith.constant 0 : index
    %190 = vector.load %arg16[%c0_68, %c0_69] : memref<64x128xbf16, #tpu.memory_space<vmem>>, vector<64x128xbf16>
    %cst_70 = arith.constant dense<0.000000e+00> : vector<32x128xf32>
    %191 = tpu.matmul %189, %190, %cst_70 {dimension_numbers = #tpu.dot_dimension_numbers<[1], [0], [0], [1], [0, 0, 1, 1], [], []>} : vector<32x64xbf16>, vector<64x128xbf16>, vector<32x128xf32> -> vector<32x128xf32>
    %192 = arith.truncf %188 : vector<32x64xf32> to vector<32x64xbf16>
    %c0_71 = arith.constant 0 : index
    %c0_72 = arith.constant 0 : index
    %193 = vector.load %arg18[%c0_71, %c0_72] : memref<64x128xbf16, #tpu.memory_space<vmem>>, vector<64x128xbf16>
    %cst_73 = arith.constant dense<0.000000e+00> : vector<32x128xf32>
    %194 = tpu.matmul %192, %193, %cst_73 {dimension_numbers = #tpu.dot_dimension_numbers<[1], [0], [0], [1], [0, 0, 1, 1], [], []>} : vector<32x64xbf16>, vector<64x128xbf16>, vector<32x128xf32> -> vector<32x128xf32>
    %195 = arith.negf %191 : vector<32x128xf32>
    %196 = math.exp %195 : vector<32x128xf32>
    %cst_74 = arith.constant 1.000000e+00 : f32
    %197 = vector.broadcast %cst_74 : f32 to vector<32x128xf32>
    %198 = arith.addf %197, %196 : vector<32x128xf32>
    %199 = arith.divf %197, %198 : vector<32x128xf32>
    %200 = arith.mulf %191, %199 : vector<32x128xf32>
    %201 = arith.mulf %200, %194 : vector<32x128xf32>
    %202 = arith.truncf %201 : vector<32x128xf32> to vector<32x128xbf16>
    %c0_75 = arith.constant 0 : index
    %c0_76 = arith.constant 0 : index
    %203 = vector.load %arg17[%c0_75, %c0_76] : memref<128x64xbf16, #tpu.memory_space<vmem>>, vector<128x64xbf16>
    %cst_77 = arith.constant dense<0.000000e+00> : vector<32x64xf32>
    %204 = tpu.matmul %202, %203, %cst_77 {dimension_numbers = #tpu.dot_dimension_numbers<[1], [0], [0], [1], [0, 0, 1, 1], [], []>} : vector<32x128xbf16>, vector<128x64xbf16>, vector<32x64xf32> -> vector<32x64xf32>
    %205 = arith.addf %175, %204 : vector<32x64xf32>
    %c0_78 = arith.constant 0 : index
    %c0_79 = arith.constant 0 : index
    %206 = vector.load %arg19[%c0_78, %c0_79] : memref<32x64xf32, #tpu.memory_space<vmem>>, vector<32x64xf32>
    tpu.vector_store %arg19[%c0_78, %c0_79], %205 {strides = array<i32>} : memref<32x64xf32, #tpu.memory_space<vmem>>, vector<32x64xf32>,
    return
  }
}

</mosaic_0001>

<bundles_post_ra>
// kernel: transformer_block.1
= control target key start
LH: loop header
LB: loop body
LE: loop exit
PB: predicated region body
PF: predicated region fallthrough
CT: control target
= control target key end

     0   :  { %s3567_s0 = inlined_call_operand.vmem [shape: f32[32,64], index: 0, kind: input, shape index: {}]   ;;  %s3568_s1 = inlined_call_operand.vmem [shape: f32[32,96], index: 1, kind: input, shape index: {}]   ;;  %s3569_s2 = inlined_call_operand.vmem [shape: f32[32,96], index: 2, kind: input, shape index: {}]   ;;  %s3570_s3 = inlined_call_operand.vmem [shape: f32[32,96], index: 3, kind: input, shape index: {}]   ;;  %s3571_s4 = inlined_call_operand.vmem [shape: f32[32,4], index: 4, kind: input, shape index: {}]   ;;  %s3572_s5 = inlined_call_operand.vmem [shape: f32[32,4], index: 5, kind: input, shape index: {}]   ;;  %s3573_s6 = inlined_call_operand.vmem [shape: f32[32,32], index: 6, kind: input, shape index: {}]   ;;  %s3574_s7 = inlined_call_operand.vmem [shape: f32[1,64], index: 7, kind: input, shape index: {}]   ;;  %s3575_s8 = inlined_call_operand.hbm [shape: f32[1,32], index: 8, kind: input, shape index: {}]   ;;  %s3576_s9 = inlined_call_operand.hbm [shape: f32[1,32], index: 9, kind: input, shape index: {}]   ;;  %s3577_s10 = inlined_call_operand.hbm [shape: f32[1,64], index: 10, kind: input, shape index: {}]   ;;  %s3578_s11 = inlined_call_operand.vmem [shape: bf16[64,32], index: 11, kind: input, shape index: {}]   ;;  %s3579_s12 = inlined_call_operand.hbm [shape: bf16[32,96], index: 12, kind: input, shape index: {}]   ;;  %s3580_s13 = inlined_call_operand.vmem [shape: bf16[64,40], index: 13, kind: input, shape index: {}]   ;;  %s3581_s14 = inlined_call_operand.hbm [shape: bf16[32,128], index: 14, kind: input, shape index: {}]   ;;  %s3582_s15 = inlined_call_operand.vmem [shape: bf16[64,64], index: 15, kind: input, shape index: {}]   ;;  %s3583_s16 = inlined_call_operand.vmem [shape: bf16[64,128], index: 16, kind: input, shape index: {}]   ;;  %s3584_s17 = inlined_call_operand.vmem [shape: bf16[128,64], index: 17, kind: input, shape index: {}]   ;;  %s3585_s18 = inlined_call_operand.vmem [shape: bf16[64,128], index: 18, kind: input, shape index: {}]   ;;  %s3586_s19 = inlined_call_operand.hbm [shape: f32[32,64], index: 19, kind: output, shape index: {}]  }
   0x1   :  { %3591 = sst [smem:[#allocation16_spill]] %s3567_s0 }
   0x2   :  { %3592 = sst [smem:[#allocation17_spill]] %s3568_s1 }
   0x3   :  { %3593 = sst [smem:[#allocation18_spill]] %s3569_s2 }
   0x4   :  { %3594 = sst [smem:[#allocation19_spill]] %s3570_s3 }
   0x5   :  { %24 = vsyncpa [#allocation3], 0 }
   0x6   :  { %25 = vsyncpa [#allocation6], 0 }
   0x7   :  { %26 = vsyncpa [#allocation9], 0 }
   0x8   :  { %27 = vsyncpa [#allocation4], 0  ;;  %s2898_s0 = smov [#allocation5]   ;;  %s2899_s20 = smov [#allocation8]  }
   0x9   :  { %s60_s30 = sshll.u32 %s2898_s0, 4  ;;  %s81_s21 = sshll.u32 %s2899_s20, 4  ;;  %s61_s30 = int_to_ptr.vmem [resolvable:$true] %s60_s30  ;;  %s82_s21 = int_to_ptr.vmem [resolvable:$true] %s81_s21 }
   0xa   :  { %s2778_s1 = scalar_lea.vmem %s61_s30, 16  ;;  %s2782_s22 = scalar_lea.vmem %s61_s30, 32 }
   0xb   :  { %p2779_p0 = scmp.ne.s32.totalorder %s61_s30, %s2778_s1  ;;  %p2783_p1 = scmp.lt.s32.totalorder %s61_s30, %s61_s30 }
   0xc   :  { %p2784_p2 = scmp.lt.s32.totalorder %s2782_s22, %s2778_s1 }
   0xe   :  { %p2785_p3 = por %p2784_p2, %p2783_p1 }
  0x10   :  { %p2786_p4 = pnand %p2785_p3, %p2779_p0 }
  0x12   :  { %2789 = shalt.err (!%p2786_p4)
}
  0x13   :  { %63 = dma.hbm_to_vmem [thread:$0]  %s3576_s9, 16, %s61_s30, [#allocation6]  }
  0x14   :  { %s2798_s24 = scalar_lea.vmem %s82_s21, 256  ;;  %p2803_p6 = scmp.lt.s32.totalorder %s82_s21, %s82_s21 }
  0x15   :  { %p2799_p5 = scmp.ne.s32.totalorder %s82_s21, %s2798_s24  ;;  %p2804_p7 = scmp.lt.s32.totalorder %s2798_s24, %s2798_s24 }
  0x17   :  { %p2805_p8 = por %p2804_p7, %p2803_p6 }
  0x19   :  { %p2806_p9 = pnand %p2805_p8, %p2799_p5 }
  0x1b   :  { %2809 = shalt.err (!%p2806_p9)
}
  0x1c   :  { %s2900_s25 = smov 64   ;;  %s2901_s3 = smov 4  }
  0x1d   :  { %87 = dma.hbm_to_vmem [thread:$0]  %s3579_s12, 256, %s82_s21, [#allocation9], %s2900_s25, %s2900_s25, %s2901_s3  }
  0x1e   :  { %s2902_s28 = smov [#allocation2]   ;;  %s2903_s0 = smov [#allocation7]  }
  0x1f   :  { %s50_s29 = sshll.u32 %s2902_s28, 4  ;;  %s70_s9 = sshll.u32 %s2903_s0, 4  ;;  %s51_s29 = int_to_ptr.vmem [resolvable:$true] %s50_s29  ;;  %s71_s9 = int_to_ptr.vmem [resolvable:$true] %s70_s9 }
  0x20   :  { %s2818_s30 = scalar_lea.vmem %s51_s29, 16  ;;  %s2822_s20 = scalar_lea.vmem %s51_s29, 32 }
  0x21   :  { %p2819_p10 = scmp.ne.s32.totalorder %s51_s29, %s2818_s30  ;;  %p2823_p11 = scmp.lt.s32.totalorder %s51_s29, %s51_s29 }
  0x22   :  { %p2824_p12 = scmp.lt.s32.totalorder %s2822_s20, %s2818_s30 }
  0x24   :  { %p2825_p13 = por %p2824_p12, %p2823_p11 }
  0x26   :  { %p2826_p0 = pnand %p2825_p13, %p2819_p10 }
  0x28   :  { %2829 = shalt.err (!%p2826_p0)
}
  0x29   :  { %53 = dma.hbm_to_vmem [thread:$0]  %s3575_s8, 16, %s51_s29, [#allocation3]  }
  0x2a   :  { %s2838_s2 = scalar_lea.vmem %s71_s9, 16  ;;  %s2842_s12 = scalar_lea.vmem %s71_s9, 32 }
  0x2b   :  { %p2839_p1 = scmp.ne.s32.totalorder %s71_s9, %s2838_s2  ;;  %p2843_p2 = scmp.lt.s32.totalorder %s71_s9, %s71_s9 }
  0x2c   :  { %p2844_p3 = scmp.lt.s32.totalorder %s2842_s12, %s2838_s2 }
  0x2e   :  { %p2845_p4 = por %p2844_p3, %p2843_p2 }
  0x30   :  { %p2846_p5 = pnand %p2845_p4, %p2839_p1 }
  0x32   :  { %2849 = shalt.err (!%p2846_p5)
}
  0x33   :  { %73 = dma.hbm_to_vmem [thread:$0]  %s3577_s10, 16, %s71_s9, [#allocation6]  }
  0x34   :  { %s2904_s24 = smov [#allocation10]  }
  0x35   :  { %s95_s26 = sshll.u32 %s2904_s24, 4  ;;  %s96_s26 = int_to_ptr.vmem [resolvable:$true] %s95_s26 }
  0x36   :  { %s2858_s27 = scalar_lea.vmem %s96_s26, 256  ;;  %p2863_p7 = scmp.lt.s32.totalorder %s96_s26, %s96_s26 }
  0x37   :  { %p2859_p6 = scmp.ne.s32.totalorder %s96_s26, %s2858_s27  ;;  %p2864_p8 = scmp.lt.s32.totalorder %s2858_s27, %s2858_s27 }
  0x39   :  { %p2865_p9 = por %p2864_p8, %p2863_p7 }
  0x3b   :  { %p2866_p10 = pnand %p2865_p9, %p2859_p6 }
  0x3d   :  { %2869 = shalt.err (!%p2866_p10)
}
  0x3e   :  { %101 = dma.hbm_to_vmem [thread:$0]  %s3581_s14, 256, %s96_s26, [#allocation9], %s2900_s25, %s2900_s25, %s2901_s3  }
  0x3f   :  { %2890 = dma.done.wait [#allocation3], 16  }
  0x40   :  { %2891 = vsyncadd [#allocation3], 4294967280 }
  0x41   :  { %2892 = dma.done.wait [#allocation6], 32  }
  0x42   :  { %2893 = vsyncadd [#allocation6], 4294967264 }
  0x43   :  { %2894 = dma.done.wait [#allocation9], 512  }
  0x44   :  { %2895 = vsyncadd [#allocation9], 4294966784  ;;  %s3595_s0 = sld [smem:[#allocation16_spill]]  ;;  %vm134_vm0 = vcmask 523264   ;;  %v2622_v12 = vld [vmem:[%s3578_s11 + $0x18] sm:$0xff]   ;;  %v2623_v13 = vld [vmem:[%s3578_s11 + $0x10] sm:$0xff]  }
  0x45   :  { %2398 = vmatprep.subr.bf16.mxu1 %v2622_v12  ;;  %v2624_v14 = vld [vmem:[%s3578_s11 + $0x8] sm:$0xff]   ;;  %v2625_v15 = vld [vmem:[%s3578_s11] sm:$0xff]   ;;  %vm268_vm1 = vcmask 261120   ;;  %v2628_v57 = vld [vmem:[%s3580_s13 + $0x18] sm:$0xff]   ;;  %s2905_s21 = smov 36   ;;  %s2906_s9 = smov 32  }
  0x46   :  { %2399 = vmatpush3.bf16.msra.mxu1 %v2622_v12  ;;  %v2236_v33 = vld [vmem:[%s3574_s7] ss:$0 sm:$0xff]  ;;  %v2626_v55 = vld [vmem:[#allocation8 + $0x8] sm:$0xff]   ;;  %v2627_v56 = vld [vmem:[#allocation8] sm:$0xff]   ;;  %s2909_s1 = smov 100   ;;  %vm595_vm2 = vcmask 31744  }
  0x47   :  { %2400 = vmatprep.subr.bf16.mxu1 %v2623_v13  ;;  %s2910_s14 = smov 16   ;;  %s2913_s22 = smov 120   ;;  %vm843_vm3 = vcmask 130048   ;;  %vm850_vm4 = vcmask 195584   ;;  %vm855_vm5 = vcmask 326656   ;;  %vm860_vm6 = vcmask 392192  }
  0x48   :  { %s2914_s2 = smov 112   ;;  %s2915_s12 = smov 104   ;;  %vm874_vm7 = vcmask 719872   ;;  %vm869_vm8 = vcmask 588800   ;;  %vm612_vm9 = vcmask 752640  }
  0x49   :  { %s3596_s23 = sld [smem:[#allocation18_spill]]  ;;  %s2916_s30 = smov 80  }
  0x4a   :  { %v128_v0 = vld [vmem:[%s3595_s0 + $0x10] sm:$0xff]  ;;  %v126_v1 = vld [vmem:[%s3595_s0] sm:$0xff]  ;;  %v129_v2 = vld [vmem:[%s3595_s0 + $0x18] sm:$0xff]  ;;  %2401 = vmatpush3.bf16.msra.mxu1 %v2623_v13  ;;  %s3597_s11 = sld [smem:[#allocation17_spill]]  ;;  %s2917_s20 = smov 56  }
  0x4b   :  { %v132_v3 = vmul.f32 %v128_v0, %v128_v0  ;;  %v130_v4 = vmul.f32 %v126_v1, %v126_v1  ;;  %v133_v5 = vmul.f32 %v129_v2, %v129_v2  ;;  %v127_v6 = vld [vmem:[%s3595_s0 + $0x8] sm:$0xff]  ;;  %2402 = vmatprep.subr.bf16.mxu1 %v2624_v14 }
  0x4c   :  { %v131_v7 = vmul.f32 %v127_v6, %v127_v6 }
  0x4d   :  { %v141_v8 = vsel %vm134_vm0, %v132_v3, 0.0  ;;  %v135_v9 = vsel %vm134_vm0, %v130_v4, 0.0  ;;  %v144_v10 = vsel %vm134_vm0, %v133_v5, 0.0 }
  0x4e   :  { %142 = vadd.xlane.f32.xlu1 %v141_v8  ;;  %136 = vadd.xlane.f32.xlu0 %v135_v9  ;;  %v138_v11 = vsel %vm134_vm0, %v131_v7, 0.0 }
  0x4f   :  { %2403 = vmatpush3.bf16.msra.mxu1 %v2624_v14 }
  0x50   :  { %2404 = vmatprep.subr.bf16.mxu1 %v2625_v15 }
  0x52   :  { %145 = vadd.xlane.f32.xlu1 %v144_v10  ;;  %139 = vadd.xlane.f32.xlu0 %v138_v11  ;;  %v2243_v10 = vld [vmem:[#allocation2] ss:$0 sm:$0xff] }
  0x53   :  { %2405 = vmatpush3.bf16.msra.mxu1 %v2625_v15 }
  0x54   :  { %2410 = vmatprep.subr.bf16.mxu1 %v2626_v55 }
  0xd7   :  { %v143_v16 = vpop.xlane.xlu1 %142  ;;  %v137_v17 = vpop.xlane.xlu0 %136 }
  0xd8   :  { %v150_v18 = vmul.f32 0.015625, %v143_v16  ;;  %v148_v19 = vmul.f32 0.015625, %v137_v17 }
  0xda   :  { %v154_v20 = vadd.f32 1e-06, %v150_v18  ;;  %v152_v21 = vadd.f32 1e-06, %v148_v19 }
  0xdb   :  { %v146_v22 = vpop.xlane.xlu1 %145  ;;  %v140_v23 = vpop.xlane.xlu0 %139 }
  0xdc   :  { %2654 = vrsqrt.f32 %v154_v20  ;;  %v151_v24 = vmul.f32 0.015625, %v146_v22  ;;  %v149_v25 = vmul.f32 0.015625, %v140_v23  ;;  %v2630_v22 = vld [vmem:[%s3580_s13 + $0x8] sm:$0xff]   ;;  %v2631_v23 = vld [vmem:[%s3580_s13] sm:$0xff]  }
  0xdd   :  { %2656 = vrsqrt.f32 %v152_v21  ;;  %v2629_v21 = vld [vmem:[%s3580_s13 + $0x10] sm:$0xff]   ;;  %s2911_s13 = smov 40  }
  0xde   :  { %v155_v26 = vadd.f32 1e-06, %v151_v24  ;;  %v153_v27 = vadd.f32 1e-06, %v149_v25 }
  0xe0   :  { %2658 = vrsqrt.f32 %v155_v26 }
  0xe1   :  { %2660 = vrsqrt.f32 %v153_v27 }
  0xe9   :  { %v2655_v28 = vpop.eup %2654 }
  0xea   :  { %v2657_v29 = vpop.eup %2656  ;;  %v162_v30 = vmul.f32 %v2655_v28, %v128_v0 }
  0xeb   :  { %v160_v32 = vmul.f32 %v2657_v29, %v126_v1 }
  0xec   :  { %v173_v37 = vmul.f32 %v2236_v33, %v162_v30 }
  0xed   :  { %v2659_v31 = vpop.eup %2658  ;;  %v171_v39 = vmul.f32 %v2236_v33, %v160_v32 }
  0xee   :  { %v2661_v34 = vpop.eup %2660  ;;  %v163_v35 = vmul.f32 %v2659_v31, %v129_v2 }
  0xef   :  { %v161_v36 = vmul.f32 %v2661_v34, %v127_v6 }
  0xf0   :  { %v174_v38 = vmul.f32 %v2236_v33, %v163_v35 }
  0xf1   :  { %v172_v40 = vmul.f32 %v2236_v33, %v161_v36 }
  0xf2   :  { %v3074_v41 = vpack.c.bf16 %v174_v38, %v173_v37 }
  0xf3   :  { %v3076_v42 = vpack.c.bf16 %v172_v40, %v171_v39  ;;  %v658_v40 = vld [vmem:[%s3572_s5 + $0x18] sm:$0xff] }
  0xf5   :  { %2406 = vmatprep.mubr.msk.bf16.mxu1 %vm134_vm0, %v3076_v42 }
  0xf6   :  { %2407 = vmatmul.mubr.msk.bf16.vlgmr.msra.gmra.mxu1 %vm134_vm0, %v3074_v41 }
  0xf7   :  { %2411 = vmatpush3.bf16.msra.mxu1 %v2626_v55 }
  0xf8   :  { %2412 = vmatprep.subr.bf16.mxu1 %v2627_v56 }
  0xfb   :  { %2413 = vmatpush3.bf16.msra.mxu1 %v2627_v56 }
  0xfc   :  { %2418 = vmatprep.subr.bf16.mxu1 %v2628_v57 }
 0x1b6   :  { %v2408_v43 = vpop.f32.mrf.mxu1 }
 0x1b7   :  { %v266_v47 = vmul.f32 %v2408_v43, %v2408_v43 }
 0x1b8   :  { %v249_v44 = vpop.f32.mrf.mxu1 }
 0x1b9   :  { %v264_v45 = vmul.f32 %v249_v44, %v249_v44  ;;  %v275_v52 = vsel %vm268_vm1, %v266_v47, 0.0  ;;  %v3156_v47 = vld [vmem:[%s3572_s5 + $0x8] sm:$0xff] }
 0x1ba   :  { %v2409_v46 = vpop.f32.mrf.mxu1 }
 0x1bb   :  { %v269_v48 = vsel %vm268_vm1, %v264_v45, 0.0  ;;  %v267_v51 = vmul.f32 %v2409_v46, %v2409_v46  ;;  %v651_v45 = vld [vmem:[%s3571_s4] sm:$0xff] }
 0x1bc   :  { %270 = vadd.xlane.f32.xlu0 %v269_v48  ;;  %v252_v49 = vpop.f32.mrf.mxu1  ;;  %v2633_v48 = vld [vmem:[#allocation10] sm:$0xff]  }
 0x1bd   :  { %v265_v50 = vmul.f32 %v252_v49, %v252_v49  ;;  %v278_v54 = vsel %vm268_vm1, %v267_v51, 0.0 }
 0x1bf   :  { %v272_v53 = vsel %vm268_vm1, %v265_v50, 0.0 }
 0x1c0   :  { %276 = vadd.xlane.f32.xlu0 %v275_v52  ;;  %273 = vadd.xlane.f32.xlu1 %v272_v53 }
 0x1c4   :  { %279 = vadd.xlane.f32.xlu1 %v278_v54 }
 0x245   :  { %v271_v58 = vpop.xlane.xlu0 %270 }
 0x246   :  { %v282_v59 = vmul.f32 0.03125, %v271_v58 }
 0x248   :  { %v286_v60 = vadd.f32 1e-06, %v282_v59 }
 0x249   :  { %v277_v61 = vpop.xlane.xlu0 %276  ;;  %v274_v62 = vpop.xlane.xlu1 %273 }
 0x24a   :  { %v284_v63 = vmul.f32 0.03125, %v277_v61  ;;  %v283_v0 = vmul.f32 0.03125, %v274_v62  ;;  %2662 = vrsqrt.f32 %v286_v60 }
 0x24c   :  { %v288_v1 = vadd.f32 1e-06, %v284_v63  ;;  %v287_v2 = vadd.f32 1e-06, %v283_v0 }
 0x24d   :  { %v280_v3 = vpop.xlane.xlu1 %279 }
 0x24e   :  { %2664 = vrsqrt.f32 %v288_v1  ;;  %v285_v4 = vmul.f32 0.03125, %v280_v3 }
 0x24f   :  { %2666 = vrsqrt.f32 %v287_v2 }
 0x250   :  { %v289_v5 = vadd.f32 1e-06, %v285_v4 }
 0x252   :  { %2668 = vrsqrt.f32 %v289_v5 }
 0x257   :  { %v2663_v6 = vpop.eup %2662 }
 0x258   :  { %v294_v8 = vmul.f32 %v2663_v6, %v249_v44  ;;  %v654_v44 = vld [vmem:[%s3571_s4 + $0x18] sm:$0xff] }
 0x25a   :  { %v305_v14 = vmul.f32 %v2243_v10, %v294_v8 }
 0x25b   :  { %v2665_v7 = vpop.eup %2664 }
 0x25c   :  { %v2667_v9 = vpop.eup %2666  ;;  %v296_v12 = vmul.f32 %v2665_v7, %v2408_v43  ;;  %v3144_v43 = vld [vmem:[%s3572_s5] sm:$0xff] }
 0x25d   :  { %v295_v11 = vmul.f32 %v2667_v9, %v252_v49  ;;  %v652_v49 = vld [vmem:[%s3571_s4 + $0x8] sm:$0xff] }
 0x25e   :  { %v307_v18 = vmul.f32 %v2243_v10, %v296_v12 }
 0x25f   :  { %v2669_v13 = vpop.eup %2668  ;;  %v306_v15 = vmul.f32 %v2243_v10, %v295_v11 }
 0x260   :  { %v297_v16 = vmul.f32 %v2669_v13, %v2409_v46  ;;  %v2632_v46 = vld [vmem:[#allocation10 + $0x8] sm:$0xff]  }
 0x261   :  { %v309_v17 = vpack.c.bf16 %v306_v15, %v305_v14  ;;  %2430 = vmatprep.subr.bf16.mxu0 %v2632_v46 }
 0x262   :  { %v308_v19 = vmul.f32 %v2243_v10, %v297_v16  ;;  %2431 = vmatpush3.bf16.msra.mxu0 %v2632_v46  ;;  %v2254_v10 = vld [vmem:[#allocation5] ss:$0 sm:$0xff] }
 0x263   :  { %2414 = vmatprep.mubr.msk.bf16.mxu1 %vm268_vm1, %v309_v17  ;;  %2432 = vmatprep.subr.bf16.mxu0 %v2633_v48 }
 0x264   :  { %v310_v20 = vpack.c.bf16 %v308_v19, %v307_v18 }
 0x266   :  { %2415 = vmatmul.mubr.msk.bf16.vlgmr.msra.gmra.mxu1 %vm268_vm1, %v310_v20  ;;  %2433 = vmatpush3.bf16.msra.mxu0 %v2633_v48 }
 0x267   :  { %2419 = vmatpush3.bf16.msra.mxu1 %v2628_v57  ;;  %2426 = vmatprep.mubr.msk.bf16.mxu1 %vm134_vm0, %v3076_v42  ;;  %v653_v42 = vld [vmem:[%s3571_s4 + $0x10] sm:$0xff]  ;;  %s2907_s4 = smov 124  }
 0x268   :  { %2420 = vmatprep.subr.bf16.mxu1 %v2629_v21 }
 0x26b   :  { %2421 = vmatpush3.bf16.msra.mxu1 %v2629_v21 }
 0x26c   :  { %2422 = vmatprep.subr.bf16.mxu1 %v2630_v22 }
 0x26f   :  { %2423 = vmatpush3.bf16.msra.mxu1 %v2630_v22 }
 0x270   :  { %2424 = vmatprep.subr.bf16.mxu1 %v2631_v23 }
 0x273   :  { %2425 = vmatpush3.bf16.msra.mxu1 %v2631_v23 }
 0x276   :  { %2427 = vmatmul.mubr.msk.bf16.vlgmr.msra.gmra.mxu1 %vm134_vm0, %v3074_v41  ;;  %v657_v41 = vld [vmem:[%s3572_s5 + $0x10] sm:$0xff]  ;;  %s2908_s5 = smov 96  }
 0x326   :  { %v3104_v24 = vpop.f32.mrf.mxu1 }
 0x328   :  { %v3106_v25 = vpop.f32.mrf.mxu1 }
 0x32a   :  { %v3108_v26 = vpop.f32.mrf.mxu1 }
 0x32c   :  { %v3110_v27 = vpop.f32.mrf.mxu1 }
 0x336   :  { %v3112_v28 = vpop.f32.mrf.mxu1 }
 0x337   :  { %v465_v33 = vmul.f32 %v3112_v28, %v3112_v28 }
 0x338   :  { %v3114_v29 = vpop.f32.mrf.mxu1 }
 0x339   :  { %v463_v30 = vmul.f32 %v3114_v29, %v3114_v29  ;;  %v473_v36 = vsel %vm268_vm1, %v465_v33, 0.0 }
 0x33a   :  { %v3118_v31 = vpop.f32.mrf.mxu1 }
 0x33b   :  { %v467_v32 = vsel %vm268_vm1, %v463_v30, 0.0  ;;  %v466_v38 = vmul.f32 %v3118_v31, %v3118_v31 }
 0x33c   :  { %468 = vadd.xlane.f32.xlu0 %v467_v32  ;;  %v3123_v34 = vpop.f32.mrf.mxu1 }
 0x33d   :  { %v464_v35 = vmul.f32 %v3123_v34, %v3123_v34  ;;  %v476_v39 = vsel %vm268_vm1, %v466_v38, 0.0 }
 0x33f   :  { %v470_v37 = vsel %vm268_vm1, %v464_v35, 0.0 }
 0x340   :  { %474 = vadd.xlane.f32.xlu0 %v473_v36  ;;  %471 = vadd.xlane.f32.xlu1 %v470_v37 }
 0x344   :  { %477 = vadd.xlane.f32.xlu1 %v476_v39 }
 0x355   :  { %689 = vrot.lane.b32.xlu1 %v658_v40, %s2905_s21 }
 0x356   :  { %687 = vrot.lane.b32.xlu0 %v657_v41, %s2905_s21 }
 0x359   :  { %739 = vrot.lane.b32.xlu1 %v653_v42, %s2905_s21 }
 0x35a   :  { %683 = vrot.lane.b32.xlu0 %v3144_v43, %s2905_s21 }
 0x35d   :  { %741 = vrot.lane.b32.xlu1 %v654_v44, %s2905_s21 }
 0x35e   :  { %735 = vrot.lane.b32.xlu0 %v651_v45, %s2905_s21 }
 0x361   :  { %685 = vrot.lane.b32.xlu1 %v3156_v47, %s2905_s21 }
 0x362   :  { %667 = vrot.lane.b32.xlu0 %v653_v42, %s2906_s9 }
 0x365   :  { %737 = vrot.lane.b32.xlu1 %v652_v49, %s2905_s21 }
 0x366   :  { %723 = vrot.lane.b32.xlu0 %v657_v41, %s2906_s9 }
 0x369   :  { %669 = vrot.lane.b32.xlu1 %v654_v44, %s2906_s9 }
 0x36d   :  { %725 = vrot.lane.b32.xlu1 %v658_v40, %s2906_s9 }
 0x3c5   :  { %v469_v50 = vpop.xlane.xlu0 %468 }
 0x3c6   :  { %v479_v51 = vmul.f32 0.03125, %v469_v50 }
 0x3c8   :  { %v483_v52 = vadd.f32 1e-06, %v479_v51 }
 0x3c9   :  { %v475_v53 = vpop.xlane.xlu0 %474  ;;  %v472_v54 = vpop.xlane.xlu1 %471 }
 0x3ca   :  { %v481_v55 = vmul.f32 0.03125, %v475_v53  ;;  %v480_v56 = vmul.f32 0.03125, %v472_v54  ;;  %2670 = vrsqrt.f32 %v483_v52 }
 0x3cc   :  { %v485_v57 = vadd.f32 1e-06, %v481_v55  ;;  %v484_v58 = vadd.f32 1e-06, %v480_v56 }
 0x3cd   :  { %v688_v59 = vpop.permute.xlu0 %687  ;;  %v478_v60 = vpop.xlane.xlu1 %477 }
 0x3ce   :  { %2672 = vrsqrt.f32 %v485_v57  ;;  %v697_v61 = vmul.f32 %v3112_v28, %v688_v59  ;;  %v482_v62 = vmul.f32 0.03125, %v478_v60 }
 0x3cf   :  { %2674 = vrsqrt.f32 %v484_v58 }
 0x3d0   :  { %v486_v63 = vadd.f32 1e-06, %v482_v62  ;;  %707 = vrot.lane.b32.xlu0 %v697_v61, %s2907_s4 }
 0x3d1   :  { %v690_v0 = vpop.permute.xlu1 %689  ;;  %v684_v11 = vpop.permute.xlu0 %683 }
 0x3d2   :  { %2676 = vrsqrt.f32 %v486_v63  ;;  %v698_v1 = vmul.f32 %v3118_v31, %v690_v0  ;;  %v695_v20 = vmul.f32 %v684_v11, %v3114_v29 }
 0x3d4   :  { %709 = vrot.lane.b32.xlu1 %v698_v1, %s2907_s4 }
 0x3d5   :  { %v740_v2 = vpop.permute.xlu1 %739  ;;  %v736_v23 = vpop.permute.xlu0 %735 }
 0x3d6   :  { %v749_v3 = vmul.f32 %v3112_v28, %v740_v2  ;;  %v747_v32 = vmul.f32 %v736_v23, %v3114_v29 }
 0x3d7   :  { %v2671_v4 = vpop.eup %2670 }
 0x3d8   :  { %759 = vrot.lane.b32.xlu0 %v749_v3, %s2907_s4  ;;  %v491_v8 = vmul.f32 %v2671_v4, %v3114_v29 }
 0x3d9   :  { %v742_v5 = vpop.permute.xlu1 %741  ;;  %v668_v37 = vpop.permute.xlu0 %667 }
 0x3da   :  { %v750_v6 = vmul.f32 %v3118_v31, %v742_v5  ;;  %v502_v15 = vmul.f32 %v2254_v10, %v491_v8  ;;  %v677_v42 = vmul.f32 %v3112_v28, %v668_v37 }
 0x3db   :  { %v2673_v7 = vpop.eup %2672 }
 0x3dc   :  { %v2675_v9 = vpop.eup %2674  ;;  %663 = vrot.lane.b32.xlu0 %v651_v45, %s2906_s9  ;;  %761 = vrot.lane.b32.xlu1 %v750_v6, %s2907_s4  ;;  %v493_v13 = vmul.f32 %v2673_v7, %v3112_v28 }
 0x3dd   :  { %v492_v12 = vmul.f32 %v2675_v9, %v3123_v34  ;;  %v686_v18 = vpop.permute.xlu1 %685  ;;  %v724_v39 = vpop.permute.xlu0 %723 }
 0x3de   :  { %v504_v21 = vmul.f32 %v2254_v10, %v493_v13  ;;  %v696_v33 = vmul.f32 %v686_v18, %v3123_v34 }
 0x3df   :  { %v2677_v14 = vpop.eup %2676  ;;  %v503_v16 = vmul.f32 %v2254_v10, %v492_v12 }
 0x3e0   :  { %719 = vrot.lane.b32.xlu0 %v3144_v43, %s2906_s9  ;;  %665 = vrot.lane.b32.xlu1 %v652_v49, %s2906_s9  ;;  %v494_v17 = vmul.f32 %v2677_v14, %v3118_v31  ;;  %v733_v49 = vmul.f32 %v3112_v28, %v724_v39 }
 0x3e1   :  { %v506_v19 = vpack.c.bf16 %v503_v16, %v502_v15  ;;  %v738_v35 = vpop.permute.xlu1 %737 }
 0x3e2   :  { %v505_v22 = vmul.f32 %v2254_v10, %v494_v17  ;;  %v748_v36 = vmul.f32 %v738_v35, %v3123_v34 }
 0x3e3   :  { %2434 = vmatprep.mubr.msk.bf16.mxu0 %vm268_vm1, %v506_v19 }
 0x3e4   :  { %703 = vrot.lane.b32.xlu0 %v695_v20, %s2907_s4  ;;  %721 = vrot.lane.b32.xlu1 %v3156_v47, %s2906_s9  ;;  %v507_v30 = vpack.c.bf16 %v505_v22, %v504_v21  ;;  %s3598_s9 = sld [smem:[#allocation19_spill]] }
 0x3e5   :  { %v670_v38 = vpop.permute.xlu1 %669 }
 0x3e6   :  { %2435 = vmatmul.mubr.msk.bf16.vlgmr.msra.gmra.mxu0 %vm268_vm1, %v507_v30  ;;  %v678_v43 = vmul.f32 %v3118_v31, %v670_v38 }
 0x3e8   :  { %755 = vrot.lane.b32.xlu0 %v747_v32, %s2907_s4  ;;  %705 = vrot.lane.b32.xlu1 %v696_v33, %s2907_s4 }
 0x3e9   :  { %v726_v40 = vpop.permute.xlu1 %725 }
 0x3ea   :  { %v734_v50 = vmul.f32 %v3118_v31, %v726_v40 }
 0x3ec   :  { %757 = vrot.lane.b32.xlu1 %v748_v36, %s2907_s4 }
 0x442   :  { %v708_v41 = vpop.permute.xlu0 %707 }
 0x443   :  { %v717_v45 = vsub.f32 %v677_v42, %v708_v41 }
 0x446   :  { %v710_v44 = vpop.permute.xlu1 %709 }
 0x447   :  { %v718_v46 = vsub.f32 %v678_v43, %v710_v44 }
 0x449   :  { %v2602_v47 = vpack.i.bf16 %v718_v46, %v717_v45 }
 0x44a   :  { %v760_v48 = vpop.permute.xlu0 %759 }
 0x44b   :  { %2603 = vrot.lane.b32.xlu0 %v2602_v47, %s2908_s5  ;;  %v769_v53 = vadd.f32 %v760_v48, %v733_v49 }
 0x44e   :  { %v664_v51 = vpop.permute.xlu0 %663  ;;  %v762_v52 = vpop.permute.xlu1 %761 }
 0x44f   :  { %v770_v54 = vadd.f32 %v762_v52, %v734_v50  ;;  %v675_v60 = vmul.f32 %v664_v51, %v3114_v29 }
 0x451   :  { %v2607_v55 = vpack.i.bf16 %v770_v54, %v769_v53 }
 0x452   :  { %v720_v56 = vpop.permute.xlu0 %719  ;;  %v666_v57 = vpop.permute.xlu1 %665 }
 0x453   :  { %2608 = vrot.lane.b32.xlu1 %v2607_v55, %s2909_s1  ;;  %v676_v61 = vmul.f32 %v666_v57, %v3123_v34  ;;  %v731_v31 = vmul.f32 %v720_v56, %v3114_v29 }
 0x456   :  { %v704_v58 = vpop.permute.xlu0 %703  ;;  %v722_v59 = vpop.permute.xlu1 %721 }
 0x457   :  { %v715_v63 = vsub.f32 %v675_v60, %v704_v58  ;;  %v732_v1 = vmul.f32 %v722_v59, %v3123_v34 }
 0x45a   :  { %v706_v62 = vpop.permute.xlu1 %705  ;;  %v756_v0 = vpop.permute.xlu0 %755 }
 0x45b   :  { %v716_v28 = vsub.f32 %v676_v61, %v706_v62  ;;  %v767_v4 = vadd.f32 %v756_v0, %v731_v31  ;;  %v625_v0 = vld [vmem:[%s3596_s23] sm:$0xff] }
 0x45d   :  { %v2612_v2 = vpack.i.bf16 %v716_v28, %v715_v63 }
 0x45e   :  { %v758_v3 = vpop.permute.xlu1 %757 }
 0x45f   :  { %v768_v5 = vadd.f32 %v758_v3, %v732_v1  ;;  %2613 = vrot.lane.b32.xlu0 %v2612_v2, %s2908_s5  ;;  %v626_v2 = vld [vmem:[%s3596_s23 + $0x8] sm:$0xff] }
 0x461   :  { %v2617_v6 = vpack.i.bf16 %v768_v5, %v767_v4 }
 0x463   :  { %583 = vrot.lane.b32.xlu0 %v3106_v25, %s2901_s3  ;;  %2618 = vrot.lane.b32.xlu1 %v2617_v6, %s2909_s1  ;;  %v617_v6 = vld [vmem:[%s3597_s11] sm:$0xff]  ;;  %s2918_s1 = smov 48  }
 0x467   :  { %589 = vrot.lane.b32.xlu0 %v3108_v26, %s2901_s3  ;;  %585 = vrot.lane.b32.xlu1 %v3110_v27, %s2901_s3 }
 0x46b   :  { %587 = vrot.lane.b32.xlu1 %v3104_v24, %s2901_s3  ;;  %s2912_s3 = smov 88  }
 0x4a6   :  { %v2436_v14 = vpop.f32.mrf.mxu0 }
 0x4a8   :  { %v564_v15 = vpop.f32.mrf.mxu0 }
 0x4aa   :  { %v2437_v18 = vpop.f32.mrf.mxu0 }
 0x4ab   :  { %v3224_v36 = vpack.c.bf16 %v2437_v18, %v2436_v14  ;;  %v621_v14 = vmul.f32 %v617_v6, %v3106_v25 }
 0x4ac   :  { %v567_v33 = vpop.f32.mrf.mxu0 }
 0x4ad   :  { %v3219_v35 = vpack.c.bf16 %v567_v33, %v564_v15  ;;  %v628_v15 = vld [vmem:[%s3596_s23 + $0x18] sm:$0xff] }
 0x4bd   :  { %v2604_v29 = vpop.permute.xlu0 %2603 }
 0x4be   :  { %v2606_v7 = vunpack.i.h.bf16 %v2604_v29  ;;  %v2605_v8 = vunpack.i.l.bf16 %v2604_v29 }
 0x4c5   :  { %v2609_v34 = vpop.permute.xlu1 %2608 }
 0x4c6   :  { %v2611_v9 = vunpack.i.h.bf16 %v2609_v34  ;;  %v2610_v10 = vunpack.i.l.bf16 %v2609_v34 }
 0x4c8   :  { %v806_v11 = vsel %vm595_vm2, %v2606_v7, %v2611_v9  ;;  %v805_v12 = vsel %vm595_vm2, %v2605_v8, %v2610_v10  ;;  %v618_v7 = vld [vmem:[%s3597_s11 + $0x8] sm:$0xff]  ;;  %v637_v9 = vld [vmem:[%s3598_s9] sm:$0xff] }
 0x4c9   :  { %v808_v13 = vpack.c.bf16 %v806_v11, %v805_v12 }
 0x4cb   :  { %815 = vrot.lane.b32.xlu0 %v808_v13, %s2910_s14 }
 0x4cf   :  { %825 = vrot.lane.b32.xlu0 %v808_v13, %s2911_s13 }
 0x4d1   :  { %v2614_v16 = vpop.permute.xlu0 %2613 }
 0x4d2   :  { %v2616_v19 = vunpack.i.h.bf16 %v2614_v16  ;;  %v2615_v20 = vunpack.i.l.bf16 %v2614_v16 }
 0x4d3   :  { %833 = vrot.lane.b32.xlu0 %v808_v13, %s2900_s25 }
 0x4d5   :  { %v2619_v17 = vpop.permute.xlu1 %2618  ;;  %v584_v37 = vpop.permute.xlu0 %583 }
 0x4d6   :  { %v2621_v21 = vunpack.i.h.bf16 %v2619_v17  ;;  %v2620_v22 = vunpack.i.l.bf16 %v2619_v17  ;;  %v596_v31 = vsel %vm595_vm2, 0.0, %v584_v37  ;;  %v627_v17 = vld [vmem:[%s3596_s23 + $0x10] sm:$0xff] }
 0x4d7   :  { %841 = vrot.lane.b32.xlu0 %v808_v13, %s2912_s3  ;;  %v629_v8 = vmul.f32 %v625_v0, %v596_v31 }
 0x4d8   :  { %v804_v23 = vsel %vm595_vm2, %v2616_v19, %v2621_v21  ;;  %v803_v30 = vsel %vm595_vm2, %v2615_v20, %v2620_v22  ;;  %v638_v19 = vld [vmem:[%s3598_s9 + $0x8] sm:$0xff]  ;;  %v622_v20 = vmul.f32 %v618_v7, %v3110_v27 }
 0x4d9   :  { %v807_v32 = vpack.c.bf16 %v804_v23, %v803_v30  ;;  %v590_v38 = vpop.permute.xlu0 %589  ;;  %v586_v41 = vpop.permute.xlu1 %585  ;;  %v620_v23 = vld [vmem:[%s3597_s11 + $0x18] sm:$0xff]  ;;  %v633_v30 = vadd.f32 %v629_v8, %v621_v14 }
 0x4da   :  { %v597_v3 = vsel %vm595_vm2, 0.0, %v586_v41  ;;  %v599_v16 = vsel %vm595_vm2, 0.0, %v590_v38 }
 0x4db   :  { %813 = vrot.lane.b32.xlu1 %v807_v32, %s2910_s14  ;;  %600 = vrot.lane.b32.xlu0 %v3106_v25, %s2907_s4  ;;  %v630_v12 = vmul.f32 %v626_v2, %v597_v3  ;;  %v619_v25 = vld [vmem:[%s3597_s11 + $0x10] sm:$0xff]  ;;  %v632_v38 = vmul.f32 %v628_v15, %v599_v16 }
 0x4dd   :  { %v588_v43 = vpop.permute.xlu1 %587 }
 0x4de   :  { %v598_v18 = vsel %vm595_vm2, 0.0, %v588_v43 }
 0x4df   :  { %823 = vrot.lane.b32.xlu1 %v807_v32, %s2911_s13  ;;  %819 = vrot.lane.b32.xlu0 %v3219_v35, %s2913_s22 }
 0x4e3   :  { %831 = vrot.lane.b32.xlu1 %v807_v32, %s2900_s25  ;;  %827 = vrot.lane.b32.xlu0 %v3219_v35, %s2914_s2 }
 0x4e7   :  { %821 = vrot.lane.b32.xlu1 %v3224_v36, %s2913_s22  ;;  %835 = vrot.lane.b32.xlu0 %v3219_v35, %s2915_s12 }
 0x4eb   :  { %829 = vrot.lane.b32.xlu1 %v3224_v36, %s2914_s2  ;;  %604 = vrot.lane.b32.xlu0 %v3104_v24, %s2907_s4 }
 0x4ef   :  { %837 = vrot.lane.b32.xlu1 %v3224_v36, %s2915_s12 }
 0x4f3   :  { %839 = vrot.lane.b32.xlu1 %v807_v32, %s2912_s3  ;;  %v639_v32 = vld [vmem:[%s3598_s9 + $0x10] sm:$0xff] }
 0x4f7   :  { %602 = vrot.lane.b32.xlu1 %v3110_v27, %s2907_s4  ;;  %v623_v27 = vmul.f32 %v3104_v24, %v619_v25 }
 0x4fb   :  { %606 = vrot.lane.b32.xlu1 %v3108_v26, %s2907_s4 }
 0x53d   :  { %v816_v39 = vpop.permute.xlu0 %815 }
 0x53e   :  { %v849_v50 = vsel %vm843_vm3, %v3224_v36, %v816_v39  ;;  %v634_v39 = vadd.f32 %v630_v12, %v622_v20 }
 0x541   :  { %v826_v40 = vpop.permute.xlu0 %825 }
 0x545   :  { %v834_v42 = vpop.permute.xlu0 %833 }
 0x549   :  { %v842_v44 = vpop.permute.xlu0 %841 }
 0x54d   :  { %v814_v45 = vpop.permute.xlu1 %813  ;;  %v601_v46 = vpop.permute.xlu0 %600 }
 0x54e   :  { %v846_v54 = vsel %vm843_vm3, %v3219_v35, %v814_v45  ;;  %v613_v10 = vsel %vm612_vm9, %v601_v46, 0.0 }
 0x54f   :  { %v641_v21 = vmul.f32 %v637_v9, %v613_v10 }
 0x551   :  { %v824_v47 = vpop.permute.xlu1 %823  ;;  %v820_v48 = vpop.permute.xlu0 %819  ;;  %v645_v45 = vadd.f32 %v641_v21, %v633_v30 }
 0x552   :  { %v852_v55 = vsel %vm850_vm4, %v846_v54, %v820_v48 }
 0x553   :  { %v857_v59 = vsel %vm855_vm5, %v852_v55, %v824_v47 }
 0x555   :  { %v832_v49 = vpop.permute.xlu1 %831  ;;  %v828_v53 = vpop.permute.xlu0 %827 }
 0x556   :  { %v862_v60 = vsel %vm860_vm6, %v857_v59, %v828_v53 }
 0x557   :  { %v866_v4 = vsel %vm134_vm0, %v862_v60, %v832_v49 }
 0x559   :  { %v822_v51 = vpop.permute.xlu1 %821  ;;  %v836_v61 = vpop.permute.xlu0 %835 }
 0x55a   :  { %v854_v52 = vsel %vm850_vm4, %v849_v50, %v822_v51  ;;  %v871_v29 = vsel %vm869_vm8, %v866_v4, %v836_v61  ;;  %v3332_v61 = vld [vmem:[%s3573_s6 + $0x8] sm:$0xff] }
 0x55b   :  { %v859_v56 = vsel %vm855_vm5, %v854_v52, %v826_v40  ;;  %v631_v40 = vmul.f32 %v627_v17, %v598_v18 }
 0x55d   :  { %v830_v57 = vpop.permute.xlu1 %829  ;;  %v605_v13 = vpop.permute.xlu0 %604  ;;  %v635_v51 = vadd.f32 %v631_v40, %v623_v27 }
 0x55e   :  { %v864_v58 = vsel %vm860_vm6, %v859_v56, %v830_v57  ;;  %2446 = vmatprep.subr.bf16.mxu1 %v830_v57  ;;  %v615_v33 = vsel %vm612_vm9, %v605_v13, 0.0  ;;  %v3321_v56 = vld [vmem:[%s3573_s6] sm:$0xff] }
 0x55f   :  { %2447 = vmatpush3.bf16.msra.mxu1 %v830_v57  ;;  %v868_v63 = vsel %vm134_vm0, %v864_v58, %v834_v42  ;;  %v640_v42 = vld [vmem:[%s3598_s9 + $0x18] sm:$0xff]  ;;  %v643_v46 = vmul.f32 %v639_v32, %v615_v33  ;;  %v3326_v57 = vld [vmem:[%s3573_s6 + $0x10] sm:$0xff] }
 0x560   :  { %2448 = vmatprep.subr.bf16.mxu1 %v828_v53 }
 0x561   :  { %v838_v62 = vpop.permute.xlu1 %837 }
 0x562   :  { %v873_v28 = vsel %vm869_vm8, %v868_v63, %v838_v62 }
 0x563   :  { %v3251_v1 = vsel %vm874_vm7, %v873_v28, %v842_v44  ;;  %2449 = vmatpush3.bf16.msra.mxu1 %v828_v53  ;;  %v624_v44 = vmul.f32 %v3108_v26, %v620_v23  ;;  %v647_v53 = vadd.f32 %v643_v46, %v635_v51  ;;  %v3339_v28 = vld [vmem:[%s3573_s6 + $0x18] sm:$0xff] }
 0x564   :  { %2570 = vmatprep.subr.msk.bf16.mxu0 %vm850_vm4, %v3251_v1  ;;  %v899_v5 = vsel %vm850_vm4, %v3251_v1, 0 }
 0x565   :  { %v840_v34 = vpop.permute.xlu1 %839  ;;  %2439 = vmatpush3.bf16.xpose.msra.mxu0 %v899_v5  ;;  %v636_v50 = vadd.f32 %v632_v38, %v624_v44 }
 0x566   :  { %v3274_v11 = vsel %vm874_vm7, %v871_v29, %v840_v34 }
 0x567   :  { %2571 = vmatprep.subr.msk.bf16.mxu0 %vm850_vm4, %v3274_v11  ;;  %v897_v43 = vsel %vm850_vm4, %v3274_v11, 0 }
 0x569   :  { %v603_v22 = vpop.permute.xlu1 %602 }
 0x56a   :  { %v614_v37 = vsel %vm612_vm9, %v603_v22, 0.0 }
 0x56b   :  { %v642_v41 = vmul.f32 %v638_v19, %v614_v37 }
 0x56d   :  { %v646_v47 = vadd.f32 %v642_v41, %v634_v39  ;;  %v607_v48 = vpop.permute.xlu1 %606  ;;  %2441 = vmatpush3.bf16.xpose.msra.mxu0 %v897_v43 }
 0x56e   :  { %v616_v49 = vsel %vm612_vm9, %v607_v48, 0.0 }
 0x56f   :  { %v3310_v52 = vpack.c.bf16 %v646_v47, %v645_v45  ;;  %v644_v24 = vmul.f32 %v640_v42, %v616_v49 }
 0x571   :  { %v648_v54 = vadd.f32 %v644_v24, %v636_v50  ;;  %2442 = vmatprep.mubr.msk.bf16.mxu0 %vm850_vm4, %v3310_v52 }
 0x573   :  { %v3314_v55 = vpack.c.bf16 %v648_v54, %v647_v53  ;;  %v2634_v53 = vld [vmem:[%s3582_s15] sm:$0xff]  }
 0x575   :  { %2443 = vmatmul.mubr.msk.bf16.vlgmr.msra.gmra.mxu0 %vm850_vm4, %v3314_v55 }
 0x635   :  { %v2444_v26 = vpop.f32.mrf.mxu0 }
 0x636   :  { %v944_v62 = vadd.f32 %v2444_v26, %v3326_v57 }
 0x637   :  { %v935_v58 = vpop.f32.mrf.mxu0 }
 0x638   :  { %v936_v59 = vadd.f32 %v935_v58, %v3321_v56  ;;  %v956_v4 = vsel %vm268_vm1, %v944_v62, -inf }
 0x639   :  { %v2445_v60 = vpop.f32.mrf.mxu0 }
 0x63a   :  { %v950_v63 = vsel %vm268_vm1, %v936_v59, -inf  ;;  %v947_v2 = vadd.f32 %v2445_v60, %v3339_v28 }
 0x63b   :  { %v938_v0 = vpop.f32.mrf.mxu0  ;;  %951 = vmax.xlane.f32.xlu0 %v950_v63 }
 0x63c   :  { %v939_v31 = vadd.f32 %v938_v0, %v3332_v61  ;;  %v959_v5 = vsel %vm268_vm1, %v947_v2, -inf }
 0x63e   :  { %v953_v3 = vsel %vm268_vm1, %v939_v31, -inf }
 0x63f   :  { %954 = vmax.xlane.f32.xlu1 %v953_v3  ;;  %957 = vmax.xlane.f32.xlu0 %v956_v4 }
 0x643   :  { %960 = vmax.xlane.f32.xlu0 %v959_v5 }
 0x6c4   :  { %v952_v6 = vpop.xlane.xlu0 %951 }
 0x6c5   :  { %v962_v29 = vsub.f32 %v936_v59, %v952_v6 }
 0x6c7   :  { %v966_v13 = vmul.f32 1.442695, %v962_v29 }
 0x6c8   :  { %v955_v34 = vpop.xlane.xlu1 %954  ;;  %v958_v7 = vpop.xlane.xlu0 %957 }
 0x6c9   :  { %v963_v8 = vsub.f32 %v939_v31, %v955_v34  ;;  %v964_v9 = vsub.f32 %v944_v62, %v958_v7 }
 0x6cb   :  { %v968_v10 = vmul.f32 1.442695, %v963_v8  ;;  %v970_v12 = vmul.f32 1.442695, %v964_v9 }
 0x6cc   :  { %v961_v14 = vpop.xlane.xlu0 %960 }
 0x6cd   :  { %2678 = vpow2.f32 %v968_v10  ;;  %v965_v15 = vsub.f32 %v947_v2, %v961_v14 }
 0x6ce   :  { %2680 = vpow2.f32 %v970_v12 }
 0x6cf   :  { %v972_v16 = vmul.f32 1.442695, %v965_v15  ;;  %2682 = vpow2.f32 %v966_v13 }
 0x6d1   :  { %2684 = vpow2.f32 %v972_v16 }
 0x6da   :  { %v2679_v17 = vpop.eup %2678 }
 0x6db   :  { %v2681_v18 = vpop.eup %2680  ;;  %v977_v19 = vsel %vm268_vm1, %v2679_v17, 0.0 }
 0x6dc   :  { %978 = vadd.xlane.f32.xlu1 %v977_v19  ;;  %v980_v25 = vsel %vm268_vm1, %v2681_v18, 0.0  ;;  %v2683_v20 = vpop.eup %2682 }
 0x6dd   :  { %981 = vadd.xlane.f32.xlu0 %v980_v25  ;;  %v974_v23 = vsel %vm268_vm1, %v2683_v20, 0.0 }
 0x6de   :  { %v2685_v21 = vpop.eup %2684 }
 0x6df   :  { %v983_v22 = vsel %vm268_vm1, %v2685_v21, 0.0 }
 0x6e0   :  { %984 = vadd.xlane.f32.xlu1 %v983_v22 }
 0x6e1   :  { %975 = vadd.xlane.f32.xlu0 %v974_v23 }
 0x6f1   :  { %1063 = vrot.lane.b32.xlu1 %v3274_v11, %s2915_s12 }
 0x6f5   :  { %1057 = vrot.lane.b32.xlu1 %v3310_v52, %s2915_s12 }
 0x6f7   :  { %1065 = vrot.lane.b32.xlu0 %v3251_v1, %s2915_s12 }
 0x6f9   :  { %1059 = vrot.lane.b32.xlu1 %v3314_v55, %s2915_s12 }
 0x765   :  { %v979_v30 = vpop.xlane.xlu1 %978 }
 0x766   :  { %v982_v32 = vpop.xlane.xlu0 %981 }
 0x767   :  { %2686 = vrcp.f32 %v982_v32 }
 0x768   :  { %2688 = vrcp.f32 %v979_v30 }
 0x769   :  { %v985_v33 = vpop.xlane.xlu1 %984 }
 0x76a   :  { %2690 = vrcp.f32 %v985_v33  ;;  %v976_v37 = vpop.xlane.xlu0 %975 }
 0x76b   :  { %2692 = vrcp.f32 %v976_v37 }
 0x76d   :  { %v1064_v42 = vpop.permute.xlu1 %1063 }
 0x76e   :  { %v1066_v38 = vpop.permute.xlu0 %1065  ;;  %v1074_v51 = vsel %vm850_vm4, %v1064_v42, 0 }
 0x76f   :  { %2572 = vmatprep.subr.msk.bf16.mxu1 %vm850_vm4, %v1066_v38  ;;  %v1077_v49 = vsel %vm850_vm4, %v1066_v38, 0 }
 0x771   :  { %v1058_v50 = vpop.permute.xlu1 %1057 }
 0x774   :  { %v2687_v39 = vpop.eup %2686 }
 0x775   :  { %v2689_v40 = vpop.eup %2688  ;;  %v991_v43 = vmul.f32 %v2687_v39, %v2681_v18  ;;  %v1060_v24 = vpop.permute.xlu1 %1059 }
 0x776   :  { %v989_v46 = vmul.f32 %v2689_v40, %v2679_v17 }
 0x777   :  { %v2691_v41 = vpop.eup %2690 }
 0x778   :  { %v2693_v27 = vpop.eup %2692  ;;  %v993_v44 = vmul.f32 %v2691_v41, %v2685_v21 }
 0x779   :  { %v987_v45 = vmul.f32 %v2693_v27, %v2683_v20 }
 0x77a   :  { %v995_v47 = vpack.c.bf16 %v993_v44, %v991_v43 }
 0x77b   :  { %v994_v48 = vpack.c.bf16 %v989_v46, %v987_v45 }
 0x77d   :  { %2450 = vmatprep.mubr.msk.bf16.mxu1 %vm268_vm1, %v994_v48 }
 0x77e   :  { %2451 = vmatmul.mubr.msk.bf16.vlgmr.msra.gmra.mxu1 %vm268_vm1, %v995_v47 }
 0x77f   :  { %2455 = vmatpush3.bf16.xpose.msra.mxu1 %v1077_v49  ;;  %2458 = vmatprep.mubr.msk.bf16.mxu1 %vm850_vm4, %v1058_v50 }
 0x780   :  { %2573 = vmatprep.subr.msk.bf16.mxu1 %vm850_vm4, %v1064_v42 }
 0x787   :  { %2457 = vmatpush3.bf16.xpose.msra.mxu1 %v1074_v51 }
 0x788   :  { %2476 = vmatprep.subr.bf16.mxu1 %v2634_v53 }
 0x78e   :  { %2459 = vmatmul.mubr.msk.bf16.vlgmr.msra.gmra.mxu1 %vm850_vm4, %v1060_v24 }
 0x78f   :  { %2477 = vmatpush3.bf16.msra.mxu1 %v2634_v53 }
 0x83e   :  { %v2452_v54 = vpop.f32.mrf.mxu1 }
 0x840   :  { %v1038_v26 = vpop.f32.mrf.mxu1 }
 0x842   :  { %v2453_v58 = vpop.f32.mrf.mxu1 }
 0x843   :  { %v1054_v62 = vpack.c.bf16 %v2453_v58, %v2452_v54 }
 0x844   :  { %v1041_v59 = vpop.f32.mrf.mxu1 }
 0x845   :  { %v1053_v60 = vpack.c.bf16 %v1041_v59, %v1038_v26 }
 0x847   :  { %2478 = vmatprep.mubr.msk.bf16.mxu1 %vm843_vm3, %v1053_v60 }
 0x848   :  { %2479 = vmatmul.mubr.msk.bf16.vlgmr.msra.gmra.mxu1 %vm843_vm3, %v1054_v62 }
 0x84e   :  { %v2460_v63 = vpop.f32.mrf.mxu1 }
 0x84f   :  { %v1122_v3 = vadd.f32 %v2460_v63, %v3326_v57 }
 0x850   :  { %v1113_v0 = vpop.f32.mrf.mxu1 }
 0x851   :  { %v1114_v31 = vadd.f32 %v1113_v0, %v3321_v56  ;;  %v1134_v7 = vsel %vm268_vm1, %v1122_v3, -inf }
 0x852   :  { %v2461_v2 = vpop.f32.mrf.mxu1 }
 0x853   :  { %v1128_v4 = vsel %vm268_vm1, %v1114_v31, -inf  ;;  %v1125_v29 = vadd.f32 %v2461_v2, %v3339_v28 }
 0x854   :  { %v1116_v5 = vpop.f32.mrf.mxu1  ;;  %1129 = vmax.xlane.f32.xlu0 %v1128_v4 }
 0x855   :  { %v1117_v6 = vadd.f32 %v1116_v5, %v3332_v61  ;;  %v1137_v8 = vsel %vm268_vm1, %v1125_v29, -inf }
 0x857   :  { %v1131_v34 = vsel %vm268_vm1, %v1117_v6, -inf }
 0x858   :  { %1132 = vmax.xlane.f32.xlu1 %v1131_v34  ;;  %1135 = vmax.xlane.f32.xlu0 %v1134_v7 }
 0x85c   :  { %1138 = vmax.xlane.f32.xlu0 %v1137_v8 }
 0x8dd   :  { %v1130_v9 = vpop.xlane.xlu0 %1129 }
 0x8de   :  { %v1140_v10 = vsub.f32 %v1114_v31, %v1130_v9 }
 0x8e0   :  { %v1144_v17 = vmul.f32 1.442695, %v1140_v10 }
 0x8e1   :  { %v1133_v12 = vpop.xlane.xlu1 %1132  ;;  %v1136_v13 = vpop.xlane.xlu0 %1135 }
 0x8e2   :  { %v1142_v14 = vsub.f32 %v1122_v3, %v1136_v13  ;;  %v1141_v15 = vsub.f32 %v1117_v6, %v1133_v12 }
 0x8e4   :  { %v1148_v16 = vmul.f32 1.442695, %v1142_v14  ;;  %v1146_v25 = vmul.f32 1.442695, %v1141_v15 }
 0x8e5   :  { %v1139_v18 = vpop.xlane.xlu0 %1138 }
 0x8e6   :  { %v1143_v19 = vsub.f32 %v1125_v29, %v1139_v18  ;;  %2694 = vpow2.f32 %v1148_v16 }
 0x8e7   :  { %2696 = vpow2.f32 %v1144_v17 }
 0x8e8   :  { %v1150_v20 = vmul.f32 1.442695, %v1143_v19 }
 0x8ea   :  { %2698 = vpow2.f32 %v1150_v20 }
 0x8eb   :  { %2700 = vpow2.f32 %v1146_v25 }
 0x8f3   :  { %v2695_v21 = vpop.eup %2694 }
 0x8f4   :  { %v1158_v22 = vsel %vm268_vm1, %v2695_v21, 0.0  ;;  %v2697_v23 = vpop.eup %2696 }
 0x8f5   :  { %1159 = vadd.xlane.f32.xlu0 %v1158_v22  ;;  %v1152_v37 = vsel %vm268_vm1, %v2697_v23, 0.0 }
 0x8f7   :  { %v2699_v30 = vpop.eup %2698 }
 0x8f8   :  { %v1161_v32 = vsel %vm268_vm1, %v2699_v30, 0.0  ;;  %v2701_v33 = vpop.eup %2700 }
 0x8f9   :  { %1162 = vadd.xlane.f32.xlu1 %v1161_v32  ;;  %1153 = vadd.xlane.f32.xlu0 %v1152_v37  ;;  %v1155_v38 = vsel %vm268_vm1, %v2701_v33, 0.0 }
 0x8fd   :  { %1156 = vadd.xlane.f32.xlu1 %v1155_v38 }
 0x90e   :  { %1174 = vrot.lane.b32.xlu1 %v3219_v35, %s2916_s30 }
 0x90f   :  { %1176 = vrot.lane.b32.xlu0 %v3224_v36, %s2916_s30 }
 0x912   :  { %1365 = vrot.lane.b32.xlu1 %v3251_v1, %s2916_s30 }
 0x913   :  { %1359 = vrot.lane.b32.xlu0 %v3310_v52, %s2916_s30 }
 0x916   :  { %1363 = vrot.lane.b32.xlu1 %v3274_v11, %s2916_s30 }
 0x917   :  { %1608 = vrot.lane.b32.xlu0 %v3251_v1, %s2917_s20 }
 0x91a   :  { %1361 = vrot.lane.b32.xlu1 %v3314_v55, %s2916_s30 }
 0x91b   :  { %1602 = vrot.lane.b32.xlu0 %v3310_v52, %s2917_s20  ;;  %v2635_v52 = vld [vmem:[%s3582_s15 + $0x8] sm:$0xff]  }
 0x91e   :  { %1606 = vrot.lane.b32.xlu1 %v3274_v11, %s2917_s20 }
 0x922   :  { %1604 = vrot.lane.b32.xlu1 %v3314_v55, %s2917_s20 }
 0x97e   :  { %v1160_v39 = vpop.xlane.xlu0 %1159 }
 0x982   :  { %v1163_v40 = vpop.xlane.xlu1 %1162  ;;  %v1154_v41 = vpop.xlane.xlu0 %1153 }
 0x983   :  { %2702 = vrcp.f32 %v1163_v40 }
 0x984   :  { %2704 = vrcp.f32 %v1154_v41 }
 0x985   :  { %2706 = vrcp.f32 %v1160_v39 }
 0x986   :  { %v1157_v27 = vpop.xlane.xlu1 %1156  ;;  %v1177_v42 = vpop.permute.xlu0 %1176 }
 0x987   :  { %2708 = vrcp.f32 %v1157_v27  ;;  %2462 = vmatprep.subr.bf16.mxu0 %v1177_v42 }
 0x988   :  { %2463 = vmatpush3.bf16.msra.mxu0 %v1177_v42 }
 0x98a   :  { %v1175_v1 = vpop.permute.xlu1 %1174  ;;  %v1360_v60 = vpop.permute.xlu0 %1359 }
 0x98b   :  { %2464 = vmatprep.subr.bf16.mxu0 %v1175_v1 }
 0x98c   :  { %2465 = vmatpush3.bf16.msra.mxu0 %v1175_v1 }
 0x98d   :  { %2470 = vmatprep.subr.bf16.mxu0 %v2635_v52 }
 0x98e   :  { %v1366_v51 = vpop.permute.xlu1 %1365  ;;  %v1609_v31 = vpop.permute.xlu0 %1608 }
 0x98f   :  { %v1377_v62 = vsel %vm850_vm4, %v1366_v51, 0  ;;  %v1620_v3 = vsel %vm850_vm4, %v1609_v31, 0 }
 0x990   :  { %v2703_v11 = vpop.eup %2702 }
 0x991   :  { %v2705_v55 = vpop.eup %2704  ;;  %v1171_v45 = vmul.f32 %v2703_v11, %v2699_v30 }
 0x992   :  { %v2707_v43 = vpop.eup %2706  ;;  %v1165_v46 = vmul.f32 %v2705_v55, %v2697_v23  ;;  %v1364_v63 = vpop.permute.xlu1 %1363 }
 0x993   :  { %v1169_v48 = vmul.f32 %v2707_v43, %v2695_v21  ;;  %v1374_v0 = vsel %vm850_vm4, %v1364_v63, 0  ;;  %v1603_v4 = vpop.permute.xlu0 %1602 }
 0x994   :  { %v2709_v44 = vpop.eup %2708 }
 0x995   :  { %v1167_v47 = vmul.f32 %v2709_v44, %v2701_v33  ;;  %v1173_v50 = vpack.c.bf16 %v1171_v45, %v1169_v48 }
 0x996   :  { %v1362_v2 = vpop.permute.xlu1 %1361 }
 0x997   :  { %v1172_v49 = vpack.c.bf16 %v1167_v47, %v1165_v46 }
 0x999   :  { %2466 = vmatprep.mubr.msk.bf16.mxu0 %vm268_vm1, %v1172_v49 }
 0x99a   :  { %2467 = vmatmul.mubr.msk.bf16.vlgmr.msra.gmra.mxu0 %vm268_vm1, %v1173_v50  ;;  %v1607_v5 = vpop.permute.xlu1 %1606 }
 0x99b   :  { %2471 = vmatpush3.bf16.msra.mxu0 %v2635_v52  ;;  %v1617_v6 = vsel %vm850_vm4, %v1607_v5, 0 }
 0x99c   :  { %2574 = vmatprep.subr.msk.bf16.mxu0 %vm850_vm4, %v1366_v51 }
 0x99e   :  { %v1605_v29 = vpop.permute.xlu1 %1604 }
 0xa5a   :  { %v2468_v24 = vpop.f32.mrf.mxu0 }
 0xa5c   :  { %v1220_v53 = vpop.f32.mrf.mxu0 }
 0xa5e   :  { %v2469_v54 = vpop.f32.mrf.mxu0 }
 0xa5f   :  { %v1236_v59 = vpack.c.bf16 %v2469_v54, %v2468_v24 }
 0xa60   :  { %v1223_v26 = vpop.f32.mrf.mxu0 }
 0xa61   :  { %v1235_v58 = vpack.c.bf16 %v1223_v26, %v1220_v53 }
 0xa63   :  { %2472 = vmatprep.mubr.msk.bf16.mxu0 %vm843_vm3, %v1235_v58 }
 0xa64   :  { %2473 = vmatmul.mubr.msk.bf16.vlgmr.msra.gmra.mxu0 %vm843_vm3, %v1236_v59 }
 0xa65   :  { %2483 = vmatpush3.bf16.xpose.msra.mxu0 %v1377_v62  ;;  %2486 = vmatprep.mubr.msk.bf16.mxu0 %vm850_vm4, %v1360_v60 }
 0xa66   :  { %2575 = vmatprep.subr.msk.bf16.mxu0 %vm850_vm4, %v1364_v63 }
 0xa6d   :  { %2485 = vmatpush3.bf16.xpose.msra.mxu0 %v1374_v0 }
 0xa6e   :  { %2576 = vmatprep.subr.msk.bf16.mxu0 %vm850_vm4, %v1609_v31 }
 0xa74   :  { %2487 = vmatmul.mubr.msk.bf16.vlgmr.msra.gmra.mxu0 %vm850_vm4, %v1362_v2 }
 0xa75   :  { %2505 = vmatpush3.bf16.xpose.msra.mxu0 %v1620_v3  ;;  %2508 = vmatprep.mubr.msk.bf16.mxu0 %vm850_vm4, %v1603_v4 }
 0xa76   :  { %2577 = vmatprep.subr.msk.bf16.mxu0 %vm850_vm4, %v1607_v5 }
 0xa7d   :  { %2507 = vmatpush3.bf16.xpose.msra.mxu0 %v1617_v6 }
 0xa84   :  { %2509 = vmatmul.mubr.msk.bf16.vlgmr.msra.gmra.mxu0 %vm850_vm4, %v1605_v29 }
 0xb24   :  { %v3412_v34 = vpop.f32.mrf.mxu0 }
 0xb26   :  { %v3414_v7 = vpop.f32.mrf.mxu0 }
 0xb28   :  { %v3416_v8 = vpop.f32.mrf.mxu0 }
 0xb2a   :  { %v3418_v9 = vpop.f32.mrf.mxu0 }
 0xb34   :  { %v2488_v10 = vpop.f32.mrf.mxu0 }
 0xb35   :  { %v1422_v15 = vadd.f32 %v2488_v10, %v3326_v57 }
 0xb36   :  { %v1413_v12 = vpop.f32.mrf.mxu0 }
 0xb37   :  { %v1414_v13 = vadd.f32 %v1413_v12, %v3321_v56  ;;  %v1434_v20 = vsel %vm268_vm1, %v1422_v15, -inf }
 0xb38   :  { %v2489_v14 = vpop.f32.mrf.mxu0 }
 0xb39   :  { %v1428_v16 = vsel %vm268_vm1, %v1414_v13, -inf  ;;  %v1425_v19 = vadd.f32 %v2489_v14, %v3339_v28 }
 0xb3a   :  { %v1416_v17 = vpop.f32.mrf.mxu0  ;;  %1429 = vmax.xlane.f32.xlu0 %v1428_v16 }
 0xb3b   :  { %v1417_v18 = vadd.f32 %v1416_v17, %v3332_v61  ;;  %v1437_v21 = vsel %vm268_vm1, %v1425_v19, -inf }
 0xb3d   :  { %v1431_v25 = vsel %vm268_vm1, %v1417_v18, -inf }
 0xb3e   :  { %1432 = vmax.xlane.f32.xlu1 %v1431_v25  ;;  %1435 = vmax.xlane.f32.xlu0 %v1434_v20 }
 0xb42   :  { %1438 = vmax.xlane.f32.xlu0 %v1437_v21 }
 0xb44   :  { %v2510_v47 = vpop.f32.mrf.mxu0 }
 0xb45   :  { %v1665_v53 = vadd.f32 %v2510_v47, %v3326_v57 }
 0xb46   :  { %v1656_v48 = vpop.f32.mrf.mxu0 }
 0xb47   :  { %v1657_v24 = vadd.f32 %v1656_v48, %v3321_v56  ;;  %v1677_v59 = vsel %vm268_vm1, %v1665_v53, -inf }
 0xb48   :  { %v2511_v49 = vpop.f32.mrf.mxu0 }
 0xb49   :  { %v1668_v26 = vadd.f32 %v2511_v49, %v3339_v28  ;;  %v1671_v58 = vsel %vm268_vm1, %v1657_v24, -inf }
 0xb4a   :  { %v1659_v50 = vpop.f32.mrf.mxu0 }
 0xb4b   :  { %v1660_v51 = vadd.f32 %v1659_v50, %v3332_v61  ;;  %v1680_v60 = vsel %vm268_vm1, %v1668_v26, -inf }
 0xb4d   :  { %v1674_v54 = vsel %vm268_vm1, %v1660_v51, -inf }
 0xbc3   :  { %v1430_v22 = vpop.xlane.xlu0 %1429 }
 0xbc4   :  { %v1440_v23 = vsub.f32 %v1414_v13, %v1430_v22 }
 0xbc6   :  { %v1444_v39 = vmul.f32 1.442695, %v1440_v23 }
 0xbc7   :  { %v1433_v30 = vpop.xlane.xlu1 %1432  ;;  %v1436_v32 = vpop.xlane.xlu0 %1435 }
 0xbc8   :  { %v1442_v33 = vsub.f32 %v1422_v15, %v1436_v32  ;;  %v1441_v37 = vsub.f32 %v1417_v18, %v1433_v30 }
 0xbca   :  { %v1448_v38 = vmul.f32 1.442695, %v1442_v33  ;;  %v1446_v27 = vmul.f32 1.442695, %v1441_v37 }
 0xbcb   :  { %v1439_v40 = vpop.xlane.xlu0 %1438 }
 0xbcc   :  { %v1443_v41 = vsub.f32 %v1425_v19, %v1439_v40  ;;  %2710 = vpow2.f32 %v1448_v38 }
 0xbcd   :  { %2712 = vpow2.f32 %v1444_v39 }
 0xbce   :  { %v1450_v42 = vmul.f32 1.442695, %v1443_v41 }
 0xbd0   :  { %2714 = vpow2.f32 %v1450_v42  ;;  %v2480_v42 = vpop.f32.mrf.mxu1 }
 0xbd1   :  { %2716 = vpow2.f32 %v1446_v27  ;;  %v2636_v27 = vld [vmem:[%s3582_s15 + $0x10] sm:$0xff]  }
 0xbd9   :  { %v2711_v1 = vpop.eup %2710 }
 0xbda   :  { %v1458_v52 = vsel %vm268_vm1, %v2711_v1, 0.0  ;;  %v2713_v11 = vpop.eup %2712 }
 0xbdb   :  { %1459 = vadd.xlane.f32.xlu0 %v1458_v52  ;;  %v1452_v45 = vsel %vm268_vm1, %v2713_v11, 0.0 }
 0xbdd   :  { %v2715_v55 = vpop.eup %2714 }
 0xbde   :  { %v1461_v43 = vsel %vm268_vm1, %v2715_v55, 0.0  ;;  %v2717_v44 = vpop.eup %2716 }
 0xbdf   :  { %1462 = vadd.xlane.f32.xlu1 %v1461_v43  ;;  %1453 = vadd.xlane.f32.xlu0 %v1452_v45  ;;  %v1455_v46 = vsel %vm268_vm1, %v2717_v44, 0.0 }
 0xbe3   :  { %1456 = vadd.xlane.f32.xlu1 %v1455_v46 }
 0xbf4   :  { %1474 = vrot.lane.b32.xlu1 %v3219_v35, %s2918_s1 }
 0xbf5   :  { %1476 = vrot.lane.b32.xlu0 %v3224_v36, %s2918_s1 }
 0xc14   :  { %1675 = vmax.xlane.f32.xlu0 %v1674_v54 }
 0xc18   :  { %1672 = vmax.xlane.f32.xlu1 %v1671_v58  ;;  %1678 = vmax.xlane.f32.xlu0 %v1677_v59 }
 0xc1c   :  { %1681 = vmax.xlane.f32.xlu1 %v1680_v60 }
 0xc64   :  { %v1460_v62 = vpop.xlane.xlu0 %1459 }
 0xc68   :  { %v1463_v61 = vpop.xlane.xlu1 %1462  ;;  %v1454_v63 = vpop.xlane.xlu0 %1453 }
 0xc69   :  { %2718 = vrcp.f32 %v1463_v61 }
 0xc6a   :  { %2720 = vrcp.f32 %v1454_v63 }
 0xc6b   :  { %2722 = vrcp.f32 %v1460_v62 }
 0xc6c   :  { %v1457_v56 = vpop.xlane.xlu1 %1456  ;;  %v1477_v57 = vpop.permute.xlu0 %1476 }
 0xc6d   :  { %2724 = vrcp.f32 %v1457_v56  ;;  %2490 = vmatprep.subr.bf16.mxu1 %v1477_v57  ;;  %v2637_v56 = vld [vmem:[%s3582_s15 + $0x18] sm:$0xff]  }
 0xc6e   :  { %2491 = vmatpush3.bf16.msra.mxu1 %v1477_v57  ;;  %v1353_v57 = vadd.f32 %v2480_v42, %v3412_v34 }
 0xc70   :  { %v1475_v28 = vpop.permute.xlu1 %1474 }
 0xc71   :  { %2492 = vmatprep.subr.bf16.mxu1 %v1475_v28 }
 0xc72   :  { %2493 = vmatpush3.bf16.msra.mxu1 %v1475_v28 }
 0xc73   :  { %2498 = vmatprep.subr.bf16.mxu1 %v2636_v27 }
 0xc76   :  { %v2719_v0 = vpop.eup %2718 }
 0xc77   :  { %v2721_v31 = vpop.eup %2720  ;;  %v1471_v4 = vmul.f32 %v2719_v0, %v2715_v55 }
 0xc78   :  { %v2723_v2 = vpop.eup %2722  ;;  %v1465_v5 = vmul.f32 %v2721_v31, %v2713_v11 }
 0xc79   :  { %v1469_v29 = vmul.f32 %v2723_v2, %v2711_v1  ;;  %v1344_v1 = vpop.f32.mrf.mxu1 }
 0xc7a   :  { %v2725_v3 = vpop.eup %2724  ;;  %v1345_v0 = vadd.f32 %v1344_v1, %v3414_v7 }
 0xc7b   :  { %v1467_v6 = vmul.f32 %v2725_v3, %v2717_v44  ;;  %v1473_v12 = vpack.c.bf16 %v1471_v4, %v1469_v29  ;;  %v2481_v52 = vpop.f32.mrf.mxu1 }
 0xc7c   :  { %v1356_v3 = vadd.f32 %v2481_v52, %v3416_v8 }
 0xc7d   :  { %v1472_v10 = vpack.c.bf16 %v1467_v6, %v1465_v5  ;;  %v1347_v11 = vpop.f32.mrf.mxu1 }
 0xc7e   :  { %v1348_v6 = vadd.f32 %v1347_v11, %v3418_v9  ;;  %v2766_v9 = vld [vmem:[%s3595_s0] sm:$0xff] }
 0xc7f   :  { %2494 = vmatprep.mubr.msk.bf16.mxu1 %vm268_vm1, %v1472_v10 }
 0xc80   :  { %2495 = vmatmul.mubr.msk.bf16.vlgmr.msra.gmra.mxu1 %vm268_vm1, %v1473_v12 }
 0xc81   :  { %2499 = vmatpush3.bf16.msra.mxu1 %v2636_v27 }
 0xc9d   :  { %v1676_v13 = vpop.xlane.xlu0 %1675 }
 0xc9e   :  { %v1684_v18 = vsub.f32 %v1660_v51, %v1676_v13 }
 0xca0   :  { %v1689_v22 = vmul.f32 1.442695, %v1684_v18 }
 0xca1   :  { %v1673_v14 = vpop.xlane.xlu1 %1672  ;;  %v1679_v16 = vpop.xlane.xlu0 %1678 }
 0xca2   :  { %v1683_v15 = vsub.f32 %v1657_v24, %v1673_v14  ;;  %v1685_v17 = vsub.f32 %v1665_v53, %v1679_v16 }
 0xca4   :  { %v1687_v19 = vmul.f32 1.442695, %v1683_v15  ;;  %v1691_v25 = vmul.f32 1.442695, %v1685_v17 }
 0xca5   :  { %v1682_v20 = vpop.xlane.xlu1 %1681 }
 0xca6   :  { %v1686_v21 = vsub.f32 %v1668_v26, %v1682_v20  ;;  %2726 = vpow2.f32 %v1691_v25 }
 0xca7   :  { %2728 = vpow2.f32 %v1687_v19 }
 0xca8   :  { %v1693_v23 = vmul.f32 1.442695, %v1686_v21 }
 0xcaa   :  { %2730 = vpow2.f32 %v1693_v23  ;;  %v2767_v23 = vld [vmem:[%s3595_s0 + $0x18] sm:$0xff] }
 0xcab   :  { %2732 = vpow2.f32 %v1689_v22 }
 0xcb3   :  { %v2727_v30 = vpop.eup %2726 }
 0xcb4   :  { %v1701_v32 = vsel %vm268_vm1, %v2727_v30, 0.0  ;;  %v2729_v33 = vpop.eup %2728 }
 0xcb5   :  { %1702 = vadd.xlane.f32.xlu0 %v1701_v32  ;;  %v1695_v40 = vsel %vm268_vm1, %v2729_v33, 0.0 }
 0xcb7   :  { %v2731_v37 = vpop.eup %2730 }
 0xcb8   :  { %v1704_v38 = vsel %vm268_vm1, %v2731_v37, 0.0  ;;  %v2733_v39 = vpop.eup %2732 }
 0xcb9   :  { %1705 = vadd.xlane.f32.xlu1 %v1704_v38  ;;  %1696 = vadd.xlane.f32.xlu0 %v1695_v40  ;;  %v1698_v41 = vsel %vm268_vm1, %v2733_v39, 0.0 }
 0xcbd   :  { %1699 = vadd.xlane.f32.xlu1 %v1698_v41 }
 0xcce   :  { %1717 = vrot.lane.b32.xlu1 %v3219_v35, %s2910_s14 }
 0xccf   :  { %1719 = vrot.lane.b32.xlu0 %v3224_v36, %s2910_s14 }
 0xd3e   :  { %v1703_v55 = vpop.xlane.xlu0 %1702 }
 0xd40   :  { %v2496_v43 = vpop.f32.mrf.mxu1 }
 0xd42   :  { %v1706_v44 = vpop.xlane.xlu1 %1705  ;;  %v1520_v45 = vpop.f32.mrf.mxu1 }
 0xd43   :  { %v1697_v46 = vpop.xlane.xlu0 %1696  ;;  %2734 = vrcp.f32 %v1706_v44  ;;  %v2639_v44 = vld [vmem:[%s3585_s18 + $0x18] sm:$0xff]  }
 0xd44   :  { %v2497_v47 = vpop.f32.mrf.mxu1  ;;  %2736 = vrcp.f32 %v1697_v46  ;;  %v2641_v46 = vld [vmem:[%s3585_s18 + $0x10] sm:$0xff]  }
 0xd45   :  { %2738 = vrcp.f32 %v1703_v55  ;;  %v1536_v51 = vpack.c.bf16 %v2497_v47, %v2496_v43  ;;  %v2638_v43 = vld [vmem:[%s3583_s16 + $0x18] sm:$0xff]   ;;  %v2642_v47 = vld [vmem:[%s3583_s16 + $0x8] sm:$0xff]  }
 0xd46   :  { %v1523_v48 = vpop.f32.mrf.mxu1  ;;  %v1700_v49 = vpop.xlane.xlu1 %1699  ;;  %2526 = vmatprep.subr.bf16.mxu0 %v2638_v43 }
 0xd47   :  { %v1535_v50 = vpack.c.bf16 %v1523_v48, %v1520_v45  ;;  %2740 = vrcp.f32 %v1700_v49  ;;  %v1720_v35 = vpop.permute.xlu0 %1719  ;;  %2527 = vmatpush3.bf16.msra.mxu0 %v2638_v43  ;;  %v2640_v45 = vld [vmem:[%s3583_s16 + $0x10] sm:$0xff]   ;;  %v2643_v48 = vld [vmem:[%s3585_s18 + $0x8] sm:$0xff]   ;;  %v2644_v49 = vld [vmem:[%s3583_s16] sm:$0xff]  }
 0xd48   :  { %2512 = vmatprep.subr.bf16.mxu1 %v1720_v35  ;;  %2528 = vmatprep.subr.bf16.mxu0 %v2640_v45 }
 0xd49   :  { %2500 = vmatprep.mubr.msk.bf16.mxu1 %vm843_vm3, %v1535_v50  ;;  %v2645_v50 = vld [vmem:[%s3585_s18] sm:$0xff]  }
 0xd4a   :  { %2501 = vmatmul.mubr.msk.bf16.vlgmr.msra.gmra.mxu1 %vm843_vm3, %v1536_v51  ;;  %v1718_v36 = vpop.permute.xlu1 %1717 }
 0xd4b   :  { %2513 = vmatpush3.bf16.msra.mxu1 %v1720_v35  ;;  %2529 = vmatpush3.bf16.msra.mxu0 %v2640_v45 }
 0xd4c   :  { %2514 = vmatprep.subr.bf16.mxu1 %v1718_v36  ;;  %2530 = vmatprep.subr.bf16.mxu0 %v2642_v47 }
 0xd4f   :  { %2515 = vmatpush3.bf16.msra.mxu1 %v1718_v36  ;;  %2531 = vmatpush3.bf16.msra.mxu0 %v2642_v47 }
 0xd50   :  { %v2735_v24 = vpop.eup %2734  ;;  %2520 = vmatprep.subr.bf16.mxu1 %v2637_v56  ;;  %2532 = vmatprep.subr.bf16.mxu0 %v2644_v49 }
 0xd51   :  { %v2737_v53 = vpop.eup %2736  ;;  %v1714_v58 = vmul.f32 %v2735_v24, %v2731_v37  ;;  %v2768_v37 = vld [vmem:[%s3595_s0 + $0x10] sm:$0xff] }
 0xd52   :  { %v2739_v54 = vpop.eup %2738  ;;  %v1708_v59 = vmul.f32 %v2737_v53, %v2729_v33 }
 0xd53   :  { %v1712_v62 = vmul.f32 %v2739_v54, %v2727_v30  ;;  %2533 = vmatpush3.bf16.msra.mxu0 %v2644_v49 }
 0xd54   :  { %v2741_v26 = vpop.eup %2740 }
 0xd55   :  { %v1710_v60 = vmul.f32 %v2741_v26, %v2733_v39  ;;  %v1716_v63 = vpack.c.bf16 %v1714_v58, %v1712_v62  ;;  %v2769_v39 = vld [vmem:[%s3595_s0 + $0x8] sm:$0xff] }
 0xd57   :  { %v1715_v61 = vpack.c.bf16 %v1710_v60, %v1708_v59 }
 0xd59   :  { %2516 = vmatprep.mubr.msk.bf16.mxu1 %vm268_vm1, %v1715_v61 }
 0xd5a   :  { %2517 = vmatmul.mubr.msk.bf16.vlgmr.msra.gmra.mxu1 %vm268_vm1, %v1716_v63 }
 0xd5b   :  { %2521 = vmatpush3.bf16.msra.mxu1 %v2637_v56 }
 0xd5c   :  { %2538 = vmatprep.subr.bf16.mxu1 %v2639_v44 }
 0xe0a   :  { %v2502_v28 = vpop.f32.mrf.mxu1 }
 0xe0b   :  { %v1600_v31 = vadd.f32 %v2502_v28, %v1353_v57 }
 0xe0c   :  { %v1583_v2 = vpop.f32.mrf.mxu1 }
 0xe0d   :  { %v1598_v4 = vadd.f32 %v1583_v2, %v1345_v0  ;;  %v2287_v0 = vld [vmem:[#allocation7] ss:$0 sm:$0xff] }
 0xe0e   :  { %v2503_v5 = vpop.f32.mrf.mxu1 }
 0xe0f   :  { %v1601_v29 = vadd.f32 %v2503_v5, %v1356_v3 }
 0xe10   :  { %v1586_v10 = vpop.f32.mrf.mxu1 }
 0xe11   :  { %v1599_v12 = vadd.f32 %v1586_v10, %v1348_v6 }
 0xe1a   :  { %v2518_v13 = vpop.f32.mrf.mxu1 }
 0xe1c   :  { %v1763_v14 = vpop.f32.mrf.mxu1 }
 0xe1e   :  { %v2519_v15 = vpop.f32.mrf.mxu1 }
 0xe1f   :  { %v1779_v34 = vpack.c.bf16 %v2519_v15, %v2518_v13  ;;  %v2647_v15 = vld [vmem:[%s3584_s17 + $0x30] sm:$0xff]  }
 0xe20   :  { %v1766_v16 = vpop.f32.mrf.mxu1 }
 0xe21   :  { %v1778_v17 = vpack.c.bf16 %v1766_v16, %v1763_v14  ;;  %v2646_v14 = vld [vmem:[%s3584_s17 + $0x38] sm:$0xff]   ;;  %v2648_v16 = vld [vmem:[%s3584_s17 + $0x28] sm:$0xff]  }
 0xe22   :  { %2550 = vmatprep.subr.bf16.mxu0 %v2646_v14 }
 0xe23   :  { %2522 = vmatprep.mubr.msk.bf16.mxu1 %vm843_vm3, %v1778_v17  ;;  %v2649_v17 = vld [vmem:[%s3584_s17 + $0x20] sm:$0xff]  }
 0xe24   :  { %2523 = vmatmul.mubr.msk.bf16.vlgmr.msra.gmra.mxu1 %vm843_vm3, %v1779_v34  ;;  %v2650_v34 = vld [vmem:[%s3584_s17 + $0x18] sm:$0xff]  }
 0xe25   :  { %2539 = vmatpush3.bf16.msra.mxu1 %v2639_v44 }
 0xe26   :  { %2540 = vmatprep.subr.bf16.mxu1 %v2641_v46 }
 0xe29   :  { %2541 = vmatpush3.bf16.msra.mxu1 %v2641_v46 }
 0xe2a   :  { %2542 = vmatprep.subr.bf16.mxu1 %v2643_v48 }
 0xe2d   :  { %2543 = vmatpush3.bf16.msra.mxu1 %v2643_v48 }
 0xe2e   :  { %2544 = vmatprep.subr.bf16.mxu1 %v2645_v50 }
 0xe31   :  { %2545 = vmatpush3.bf16.msra.mxu1 %v2645_v50 }
 0xee4   :  { %v2524_v7 = vpop.f32.mrf.mxu1 }
 0xee5   :  { %v1843_v25 = vadd.f32 %v2524_v7, %v1600_v31  ;;  %v2651_v7 = vld [vmem:[%s3584_s17 + $0x10] sm:$0xff]  }
 0xee6   :  { %v1826_v18 = vpop.f32.mrf.mxu1 }
 0xee7   :  { %v1841_v8 = vadd.f32 %v1826_v18, %v1598_v4  ;;  %v3483_v38 = vadd.f32 %v2768_v37, %v1843_v25  ;;  %v2652_v18 = vld [vmem:[%s3584_s17 + $0x8] sm:$0xff]  }
 0xee8   :  { %v2525_v19 = vpop.f32.mrf.mxu1 }
 0xee9   :  { %v3471_v20 = vadd.f32 %v2766_v9, %v1841_v8  ;;  %v1844_v21 = vadd.f32 %v2525_v19, %v1601_v29  ;;  %v1851_v11 = vmul.f32 %v3483_v38, %v3483_v38  ;;  %v2653_v8 = vld [vmem:[%s3584_s17] sm:$0xff]   ;;  %s2919_s17 = smov [#allocation11]  }
 0xeea   :  { %v1829_v22 = vpop.f32.mrf.mxu1  ;;  %s2222_s28 = sshll.u32 %s2919_s17, 4  ;;  %s2223_s28 = int_to_ptr.vmem [resolvable:$true] %s2222_s28 }
 0xeeb   :  { %v3476_v30 = vadd.f32 %v2767_v23, %v1844_v21  ;;  %v1842_v32 = vadd.f32 %v1829_v22, %v1599_v12  ;;  %v1849_v33 = vmul.f32 %v3471_v20, %v3471_v20  ;;  %v1859_v55 = vsel %vm134_vm0, %v1851_v11, 0.0  ;;  %s2870_s7 = scalar_lea.vmem %s2223_s28, 512  ;;  %p2875_p12 = scmp.lt.s32.totalorder %s2223_s28, %s2223_s28 }
 0xeec   :  { %p2871_p11 = scmp.ne.s32.totalorder %s2223_s28, %s2870_s7  ;;  %p2876_p13 = scmp.lt.s32.totalorder %s2870_s7, %s2870_s7 }
 0xeed   :  { %v3488_v40 = vadd.f32 %v2769_v39, %v1842_v32  ;;  %v1853_v41 = vsel %vm134_vm0, %v1849_v33, 0.0  ;;  %v1852_v27 = vmul.f32 %v3476_v30, %v3476_v30 }
 0xeee   :  { %1854 = vadd.xlane.f32.xlu1 %v1853_v41  ;;  %p2877_p0 = por %p2876_p13, %p2875_p12 }
 0xeef   :  { %v1850_v42 = vmul.f32 %v3488_v40, %v3488_v40  ;;  %v1862_v1 = vsel %vm134_vm0, %v1852_v27, 0.0 }
 0xef0   :  { %p2878_p1 = pnand %p2877_p0, %p2871_p11 }
 0xef1   :  { %v1856_v52 = vsel %vm134_vm0, %v1850_v42, 0.0 }
 0xef2   :  { %1863 = vadd.xlane.f32.xlu1 %v1862_v1  ;;  %1857 = vadd.xlane.f32.xlu0 %v1856_v52 }
 0xef6   :  { %1860 = vadd.xlane.f32.xlu0 %v1859_v55 }
 0xf77   :  { %v1855_v35 = vpop.xlane.xlu1 %1854 }
 0xf78   :  { %v1865_v51 = vmul.f32 0.015625, %v1855_v35 }
 0xf7a   :  { %v1869_v36 = vadd.f32 1e-06, %v1865_v51 }
 0xf7b   :  { %v1864_v24 = vpop.xlane.xlu1 %1863  ;;  %v1858_v53 = vpop.xlane.xlu0 %1857 }
 0xf7c   :  { %v1868_v54 = vmul.f32 0.015625, %v1864_v24  ;;  %v1866_v26 = vmul.f32 0.015625, %v1858_v53  ;;  %2742 = vrsqrt.f32 %v1869_v36 }
 0xf7e   :  { %v1872_v58 = vadd.f32 1e-06, %v1868_v54  ;;  %v1870_v59 = vadd.f32 1e-06, %v1866_v26 }
 0xf7f   :  { %v1861_v60 = vpop.xlane.xlu0 %1860 }
 0xf80   :  { %2744 = vrsqrt.f32 %v1872_v58  ;;  %v1867_v62 = vmul.f32 0.015625, %v1861_v60 }
 0xf81   :  { %2746 = vrsqrt.f32 %v1870_v59 }
 0xf82   :  { %v1871_v61 = vadd.f32 1e-06, %v1867_v62 }
 0xf84   :  { %2748 = vrsqrt.f32 %v1871_v61 }
 0xf89   :  { %v2743_v63 = vpop.eup %2742 }
 0xf8a   :  { %v1877_v57 = vmul.f32 %v2743_v63, %v3471_v20 }
 0xf8c   :  { %v1888_v4 = vmul.f32 %v2287_v0, %v1877_v57 }
 0xf8d   :  { %v2745_v56 = vpop.eup %2744 }
 0xf8e   :  { %v2747_v28 = vpop.eup %2746  ;;  %v1880_v2 = vmul.f32 %v2745_v56, %v3476_v30 }
 0xf8f   :  { %v1878_v31 = vmul.f32 %v2747_v28, %v3488_v40 }
 0xf90   :  { %v1891_v12 = vmul.f32 %v2287_v0, %v1880_v2 }
 0xf91   :  { %v2749_v3 = vpop.eup %2748  ;;  %v1889_v5 = vmul.f32 %v2287_v0, %v1878_v31 }
 0xf92   :  { %v1879_v6 = vmul.f32 %v2749_v3, %v3483_v38 }
 0xf93   :  { %v1892_v29 = vpack.c.bf16 %v1889_v5, %v1888_v4 }
 0xf94   :  { %v1890_v10 = vmul.f32 %v2287_v0, %v1879_v6 }
 0xf95   :  { %2534 = vmatprep.mubr.msk.bf16.mxu0 %vm134_vm0, %v1892_v29  ;;  %2546 = vmatprep.mubr.msk.bf16.mxu1 %vm134_vm0, %v1892_v29 }
 0xf96   :  { %v1893_v13 = vpack.c.bf16 %v1891_v12, %v1890_v10 }
 0xf98   :  { %2535 = vmatmul.mubr.msk.bf16.vlgmr.msra.gmra.mxu0 %vm134_vm0, %v1893_v13  ;;  %2547 = vmatmul.mubr.msk.bf16.vlgmr.msra.gmra.mxu1 %vm134_vm0, %v1893_v13 }
 0xf99   :  { %2551 = vmatpush3.bf16.msra.mxu0 %v2646_v14 }
 0xf9a   :  { %2552 = vmatprep.subr.bf16.mxu0 %v2647_v15 }
 0xf9d   :  { %2553 = vmatpush3.bf16.msra.mxu0 %v2647_v15 }
 0xf9e   :  { %2554 = vmatprep.subr.bf16.mxu0 %v2648_v16 }
 0xfa1   :  { %2555 = vmatpush3.bf16.msra.mxu0 %v2648_v16 }
 0xfa2   :  { %2556 = vmatprep.subr.bf16.mxu0 %v2649_v17 }
 0xfa5   :  { %2557 = vmatpush3.bf16.msra.mxu0 %v2649_v17 }
 0xfa6   :  { %2558 = vmatprep.subr.bf16.mxu0 %v2650_v34 }
 0xfa9   :  { %2559 = vmatpush3.bf16.msra.mxu0 %v2650_v34 }
 0xfaa   :  { %2560 = vmatprep.subr.bf16.mxu0 %v2651_v7 }
 0xfad   :  { %2561 = vmatpush3.bf16.msra.mxu0 %v2651_v7 }
 0xfae   :  { %2562 = vmatprep.subr.bf16.mxu0 %v2652_v18 }
 0xfb1   :  { %2563 = vmatpush3.bf16.msra.mxu0 %v2652_v18 }
 0xfb2   :  { %2564 = vmatprep.subr.bf16.mxu0 %v2653_v8 }
 0xfb5   :  { %2565 = vmatpush3.bf16.msra.mxu0 %v2653_v8 }
0x1058   :  { %v2536_v19 = vpop.f32.mrf.mxu0  ;;  %v2548_v55 = vpop.f32.mrf.mxu1 }
0x1059   :  { %v2302_v25 = vmul.f32 -1.442695, %v2536_v19 }
0x105a   :  { %v1966_v9 = vpop.f32.mrf.mxu0  ;;  %v2047_v43 = vpop.f32.mrf.mxu1 }
0x105b   :  { %2750 = vpow2.f32 %v2302_v25  ;;  %v2300_v21 = vmul.f32 -1.442695, %v1966_v9 }
0x105c   :  { %v2537_v22 = vpop.f32.mrf.mxu0  ;;  %v2549_v47 = vpop.f32.mrf.mxu1 }
0x105d   :  { %2752 = vpow2.f32 %v2300_v21  ;;  %v2303_v23 = vmul.f32 -1.442695, %v2537_v22 }
0x105e   :  { %v1969_v32 = vpop.f32.mrf.mxu0  ;;  %v2050_v24 = vpop.f32.mrf.mxu1 }
0x105f   :  { %2754 = vpow2.f32 %v2303_v23  ;;  %v2301_v33 = vmul.f32 -1.442695, %v1969_v32 }
0x1061   :  { %2756 = vpow2.f32 %v2301_v33 }
0x1068   :  { %v2751_v37 = vpop.eup %2750 }
0x1069   :  { %v2076_v41 = vadd.f32 1.0, %v2751_v37 }
0x106a   :  { %v2753_v39 = vpop.eup %2752 }
0x106b   :  { %v2074_v27 = vadd.f32 1.0, %v2753_v39 }
0x106c   :  { %v2755_v42 = vpop.eup %2754 }
0x106d   :  { %2758 = vrcp.f32 %v2074_v27  ;;  %v2077_v1 = vadd.f32 1.0, %v2755_v42 }
0x106e   :  { %v2757_v52 = vpop.eup %2756  ;;  %2760 = vrcp.f32 %v2076_v41 }
0x106f   :  { %2762 = vrcp.f32 %v2077_v1  ;;  %v2075_v11 = vadd.f32 1.0, %v2757_v52 }
0x1071   :  { %2764 = vrcp.f32 %v2075_v11 }
0x107a   :  { %v2759_v44 = vpop.eup %2758 }
0x107b   :  { %v2761_v45 = vpop.eup %2760  ;;  %v2086_v48 = vmul.f32 %v2759_v44, %v1966_v9 }
0x107c   :  { %v2763_v46 = vpop.eup %2762  ;;  %v2088_v35 = vmul.f32 %v2761_v45, %v2536_v19 }
0x107d   :  { %v2089_v49 = vmul.f32 %v2763_v46, %v2537_v22  ;;  %v2090_v53 = vmul.f32 %v2086_v48, %v2047_v43 }
0x107e   :  { %v2765_v50 = vpop.eup %2764  ;;  %v2092_v26 = vmul.f32 %v2548_v55, %v2088_v35 }
0x107f   :  { %v2087_v51 = vmul.f32 %v2765_v50, %v1969_v32  ;;  %v2093_v36 = vmul.f32 %v2549_v47, %v2089_v49 }
0x1081   :  { %v2091_v54 = vmul.f32 %v2087_v51, %v2050_v24  ;;  %v2095_v59 = vpack.c.bf16 %v2093_v36, %v2092_v26 }
0x1083   :  { %v2094_v58 = vpack.c.bf16 %v2091_v54, %v2090_v53 }
0x1085   :  { %2566 = vmatprep.mubr.bf16.mxu0 %v2094_v58 }
0x1086   :  { %2567 = vmatmul.mubr.bf16.vlgmr.msra.gmra.mxu0 %v2095_v59 }
0x1146   :  { %v2568_v60 = vpop.f32.mrf.mxu0 }
0x1147   :  { %v2211_v62 = vadd.f32 %v2568_v60, %v3483_v38 }
0x1148   :  { %v2194_v61 = vpop.f32.mrf.mxu0 }
0x1149   :  { %2215 = vst.msk [vmem:[#allocation11 + $0x10] sm:$0xff] %vm134_vm0, %v2211_v62  ;;  %v2209_v63 = vadd.f32 %v2194_v61, %v3471_v20 }
0x114a   :  { %v2569_v56 = vpop.f32.mrf.mxu0 }
0x114b   :  { %2213 = vst.msk [vmem:[#allocation11] sm:$0xff] %vm134_vm0, %v2209_v63  ;;  %v2212_v57 = vadd.f32 %v2569_v56, %v3476_v30 }
0x114c   :  { %v2197_v28 = vpop.f32.mrf.mxu0 }
0x114d   :  { %2216 = vst.msk [vmem:[#allocation11 + $0x18] sm:$0xff] %vm134_vm0, %v2212_v57  ;;  %v2210_v0 = vadd.f32 %v2197_v28, %v3488_v40 }
0x114f   :  { %2214 = vst.msk [vmem:[#allocation11 + $0x8] sm:$0xff] %vm134_vm0, %v2210_v0 }
0x1150   :  { %2881 = shalt.err (!%p2878_p1)
}
0x1151   :  { %s2920_s10 = smov 128   ;;  %s2921_s29 = smov 8  }
0x1152   :  { %2228 = dma.vmem_to_hbm [thread:$0]  %s2223_s28, 512, %s3586_s19, [#allocation4], %s2920_s10, %s2920_s10, %s2921_s29  }
0x1153   :  { %2896 = dma.done.wait [#allocation4], 512  }
0x1154   :  { %2897 = vsyncadd [#allocation4], 4294966784 }
0x1155   :  { %2232 = vsyncpa [#allocation3], 1 }
0x1156   :  { %2233 = vsyncpa [#allocation6], 1 }
0x1157   :  { %2234 = vsyncpa [#allocation9], 1 }
0x1158   :  { %2235 = vsyncpa [#allocation4], 1 }

</bundles_post_ra>
